<compile_context>
chip_gen: v7x
topology: tpu7x:2x2x1
jax: 0.10.0
libtpu: 0.0.40
codegen_flags: <defaults>
</compile_context>

<pallas_src>
import functools

import jax
import jax.numpy as jnp
from jax import lax
from jax.experimental import pallas as pl
from jax.experimental.pallas import tpu as pltpu


def _round_up(x, m):
    return ((x + m - 1) // m) * m


# ----------------------------- Pallas kernel ------------------------------- #

def bigru_kernel(x2_ref, wih_ref, whh_ref, bhhn_ref, dmask_ref, valid_ref,
                 wo_ref, bo_ref, y_ref, *, T, B, H):
    """Fused bidirectional GRU + tanh/max-pool/tanh/linear.

    x2_ref    : (T*2B, Kp)  block-structured inputs (fwd rows use emb[t],
                            bwd rows use emb[T-1-t]) + bias indicator columns.
    wih_ref   : (Kp, Gp)    [wih_f; wih_b; merged_bias_f; merged_bias_b], lane-padded.
    whh_ref   : (2H, Gp)    [whh_f; whh_b], lane-padded.
    bhhn_ref  : (2B, H)     per-row bhh_n (fwd rows then bwd rows).
    dmask_ref : (2B, 2H)    block mask rebuilding the widened hidden state.
    valid_ref : (T*2B, H)   precomputed 0/1 validity (packed-sequence mask).
    wo_ref    : (2H, Op)    [wo_f; wo_b], lane-padded.
    bo_ref    : (1, Op)
    y_ref     : (B, Op)     lane-dense output (sliced to O outside).
    """
    B2 = 2 * B

    # ---- hoisted input projection: one big MXU matmul (biases included) ----
    gx_all = jnp.dot(x2_ref[...], wih_ref[...],
                     preferred_element_type=jnp.float32)          # (T*2B, Gp)

    whh = whh_ref[...]
    bhhn = bhhn_ref[...]
    dmask = dmask_ref[...]
    valid_all = valid_ref[...]

    # widened hidden state: fwd rows = [h_f | 0], bwd rows = [0 | h_b]
    h_wide = jnp.zeros((B2, 2 * H), jnp.float32)
    m = jnp.full((B2, H), -jnp.inf, jnp.float32)

    # ---- fused fwd+bwd recurrence, statically unrolled (T small & static) ----
    for i in range(T):
        gx = gx_all[i * B2:(i + 1) * B2, :]                       # (2B, Gp)
        valid = valid_all[i * B2:(i + 1) * B2, :]                 # (2B, H)

        gh = jnp.dot(h_wide, whh, preferred_element_type=jnp.float32)  # (2B, Gp)

        r = jax.nn.sigmoid(gx[:, 0:H] + gh[:, 0:H])
        z = jax.nn.sigmoid(gx[:, H:2 * H] + gh[:, H:2 * H])
        n = jnp.tanh(gx[:, 2 * H:3 * H] + r * (gh[:, 2 * H:3 * H] + bhhn))

        h_prev = h_wide[:, 0:H] + h_wide[:, H:2 * H]              # compact h
        h_new = n + z * (h_prev - n)                              # (1-z)*n + z*h

        h_upd = h_prev + valid * (h_new - h_prev)                 # freeze past length
        m = jnp.maximum(m, valid * jnp.tanh(h_new))               # padded output -> 0

        h_wide = jnp.concatenate([h_upd, h_upd], axis=1) * dmask  # rebuild block form

    # ---- epilogue: tanh -> concat directions -> linear (lane-dense output) ----
    p = jnp.tanh(m)                                               # (2B, H)
    pooled = jnp.concatenate([p[0:B, :], p[B:B2, :]], axis=1)     # (B, 2H)
    y = jnp.dot(pooled, wo_ref[...], preferred_element_type=jnp.float32) + bo_ref[...]
    y_ref[...] = y


# ------------------------------ JAX wrapper -------------------------------- #

def _prep_operands(emb, inp_lens, params):
    T, B, E = emb.shape
    H = params["whh_f"].shape[0]
    O = params["bo"].shape[-1]
    B2 = 2 * B
    G = 3 * H
    GP = _round_up(G, 128)
    K = 2 * E + 2                      # block input + 2 bias indicator columns
    KP = _round_up(K, 128)
    OP = _round_up(O, 128)
    f32 = jnp.float32

    emb = emb.astype(f32)
    emb_rev = emb[::-1]                # time-reversed stream for the backward dir

    ones = jnp.ones((T, B, 1), f32)
    zeros = jnp.zeros((T, B, 1), f32)
    zE = jnp.zeros((T, B, E), f32)
    x_fwd = jnp.concatenate([emb, zE, ones, zeros], axis=-1)      # (T,B,K)
    x_bwd = jnp.concatenate([zE, emb_rev, zeros, ones], axis=-1)  # (T,B,K)
    x2 = jnp.concatenate([x_fwd, x_bwd], axis=1)                  # (T,2B,K)
    x2 = jnp.pad(x2, ((0, 0), (0, 0), (0, KP - K))).reshape(T * B2, KP)

    def merged_bias(bih, bhh):         # r,z biases merged; bih_n only (bhh_n separate)
        return jnp.concatenate([bih[:, :2 * H] + bhh[:, :2 * H], bih[:, 2 * H:]], axis=-1)

    wih_aug = jnp.concatenate(
        [params["wih_f"], params["wih_b"],
         merged_bias(params["bih_f"], params["bhh_f"]),
         merged_bias(params["bih_b"], params["bhh_b"])], axis=0)  # (K, G)
    wih_aug = jnp.pad(wih_aug, ((0, KP - K), (0, GP - G)))        # (KP, GP)

    whh_blk = jnp.concatenate([params["whh_f"], params["whh_b"]], axis=0)  # (2H, G)
    whh_blk = jnp.pad(whh_blk, ((0, 0), (0, GP - G)))                      # (2H, GP)

    bhh_n = jnp.concatenate([jnp.tile(params["bhh_f"][:, 2 * H:], (B, 1)),
                             jnp.tile(params["bhh_b"][:, 2 * H:], (B, 1))], axis=0)  # (2B,H)

    onesH = jnp.ones((B, H), f32)
    zH = jnp.zeros((B, H), f32)
    dmask = jnp.concatenate([jnp.concatenate([onesH, zH], axis=1),
                             jnp.concatenate([zH, onesH], axis=1)], axis=0)  # (2B,2H)

    lens = inp_lens.astype(jnp.int32)
    t_idx = jnp.arange(T, dtype=jnp.int32)[:, None]               # (T,1)
    v_f = (t_idx < lens[None, :]).astype(f32)                     # (T,B)
    v_b = ((T - 1 - t_idx) < lens[None, :]).astype(f32)           # (T,B)
    valid = jnp.concatenate([v_f, v_b], axis=1)                   # (T,2B)
    valid = jnp.broadcast_to(valid[:, :, None], (T, B2, H)).reshape(T * B2, H)

    wo_p = jnp.pad(jnp.concatenate([params["wo_f"], params["wo_b"]], axis=0),
                   ((0, 0), (0, OP - O)))                          # (2H, OP)
    bo_p = jnp.pad(params["bo"], ((0, 0), (0, OP - O)))            # (1, OP)

    return x2, wih_aug, whh_blk, bhh_n, dmask, valid, wo_p, bo_p, OP


def bigru_forward(inp_tokens, inp_lens, params):
    """inp_tokens: (T, B) int32, inp_lens: (B,) int32 (sorted descending)."""
    emb = params["embed"][inp_tokens]            # (T, B, E) gather = XLA glue
    T, B, E = emb.shape
    H = params["whh_f"].shape[0]
    O = params["bo"].shape[-1]

    (x2, wih_aug, whh_blk, bhh_n, dmask,
     valid, wo_p, bo_p, OP) = _prep_operands(emb, inp_lens, params)

    vspec = pl.BlockSpec(memory_space=pltpu.MemorySpace.VMEM)
    kernel = functools.partial(bigru_kernel, T=T, B=B, H=H)

    y_pad = pl.pallas_call(
        kernel,
        out_shape=jax.ShapeDtypeStruct((B, OP), jnp.float32),
        in_specs=[vspec] * 8,
        out_specs=vspec,
    )(x2, wih_aug, whh_blk, bhh_n, dmask, valid, wo_p, bo_p)
    return y_pad[:, :O]


# --------------------------- pure-JAX reference ----------------------------- #

def bigru_reference(inp_tokens, inp_lens, params):
    emb = params["embed"][inp_tokens]
    T, B, E = emb.shape
    H = params["whh_f"].shape[0]
    lens = inp_lens.astype(jnp.int32).reshape(B, 1)

    def run(wih, whh, bih, bhh, reverse):
        h = jnp.zeros((B, H), jnp.float32)
        m = jnp.full((B, H), -jnp.inf, jnp.float32)
        order = range(T - 1, -1, -1) if reverse else range(T)
        for t in order:
            x_t = emb[t]
            gx = x_t @ wih + bih
            gh = h @ whh + bhh
            r = jax.nn.sigmoid(gx[:, :H] + gh[:, :H])
            z = jax.nn.sigmoid(gx[:, H:2 * H] + gh[:, H:2 * H])
            n = jnp.tanh(gx[:, 2 * H:] + r * gh[:, 2 * H:])
            h_new = (1.0 - z) * n + z * h
            valid = t < lens
            h = jnp.where(valid, h_new, h)
            m = jnp.maximum(m, jnp.where(valid, jnp.tanh(h_new), 0.0))
        return m

    m_f = run(params["wih_f"], params["whh_f"], params["bih_f"], params["bhh_f"], False)
    m_b = run(params["wih_b"], params["whh_b"], params["bih_b"], params["bhh_b"], True)
    pooled = jnp.tanh(jnp.concatenate([m_f, m_b], axis=-1))
    w_o = jnp.concatenate([params["wo_f"], params["wo_b"]], axis=0)
    return pooled @ w_o + params["bo"]


# ------------------------------ param init --------------------------------- #

def init_params(key, vocab, E, H, O):
    ks = jax.random.split(key, 12)
    s = 1.0 / float(jnp.sqrt(jnp.float32(H)))
    u = lambda k, shape: jax.random.uniform(k, shape, jnp.float32, -s, s)
    return dict(
        embed=jax.random.normal(ks[0], (vocab, E), jnp.float32) * 0.1,
        # forward direction (weights stored transposed, gate order [r, z, n])
        wih_f=u(ks[1], (E, 3 * H)), whh_f=u(ks[2], (H, 3 * H)),
        bih_f=u(ks[3], (1, 3 * H)), bhh_f=u(ks[4], (1, 3 * H)),
        # backward direction
        wih_b=u(ks[5], (E, 3 * H)), whh_b=u(ks[6], (H, 3 * H)),
        bih_b=u(ks[7], (1, 3 * H)), bhh_b=u(ks[8], (1, 3 * H)),
        # h2o linear: (2H, O) split into forward/backward halves, plus bias
        wo_f=u(ks[9], (H, O)), wo_b=u(ks[10], (H, O)),
        bo=u(ks[11], (1, O)),
    )


# --------------------------------- main ------------------------------------ #

if __name__ == "__main__":
    VOCAB, EMBED, HIDDEN, OUT = 50, 32, 32, 5
    T, B = 8, 4

    key = jax.random.PRNGKey(0)
    k_par, k_tok = jax.random.split(key)
    params = init_params(k_par, VOCAB, EMBED, HIDDEN, OUT)

    inp_tokens = jax.random.randint(k_tok, (T, B), 0, VOCAB, dtype=jnp.int32)
    inp_lens = jnp.array([8, 6, 5, 3], dtype=jnp.int32)   # sorted descending, max == T

    y = bigru_forward(inp_tokens, inp_lens, params)
    y = jax.block_until_ready(y)

    y_ref = jax.block_until_ready(bigru_reference(inp_tokens, inp_lens, params))
    assert y.shape == (B, OUT)
    assert bool(jnp.allclose(y, y_ref, atol=5e-2, rtol=5e-2)), (y, y_ref)

    print("KERNEL_OK")
</pallas_src>

<mosaic_0001>
module attributes {stable_mosaic.version = 11 : i64} {
  func.func @bigru_kernel(%arg0: memref<64x128xf32, #tpu.memory_space<vmem>>, %arg1: memref<128x128xf32, #tpu.memory_space<vmem>>, %arg2: memref<64x128xf32, #tpu.memory_space<vmem>>, %arg3: memref<8x32xf32, #tpu.memory_space<vmem>>, %arg4: memref<8x64xf32, #tpu.memory_space<vmem>>, %arg5: memref<64x32xf32, #tpu.memory_space<vmem>>, %arg6: memref<64x128xf32, #tpu.memory_space<vmem>>, %arg7: memref<1x128xf32, #tpu.memory_space<vmem>>, %arg8: memref<4x128xf32, #tpu.memory_space<vmem>>) attributes {dimension_semantics = [], scalar_prefetch = 0 : i64, scratch_operands = 0 : i64, tpu.core_type = #tpu.core_type<tc>} {
    %c0 = arith.constant 0 : index
    %c0_0 = arith.constant 0 : index
    %0 = vector.load %arg0[%c0, %c0_0] : memref<64x128xf32, #tpu.memory_space<vmem>>, vector<64x128xf32>
    %c0_1 = arith.constant 0 : index
    %c0_2 = arith.constant 0 : index
    %1 = vector.load %arg1[%c0_1, %c0_2] : memref<128x128xf32, #tpu.memory_space<vmem>>, vector<128x128xf32>
    %cst = arith.constant dense<0.000000e+00> : vector<64x128xf32>
    %2 = tpu.matmul %0, %1, %cst {dimension_numbers = #tpu.dot_dimension_numbers<[1], [0], [0], [1], [0, 0, 1, 1], [], []>} : vector<64x128xf32>, vector<128x128xf32>, vector<64x128xf32> -> vector<64x128xf32>
    %c0_3 = arith.constant 0 : index
    %c0_4 = arith.constant 0 : index
    %3 = vector.load %arg2[%c0_3, %c0_4] : memref<64x128xf32, #tpu.memory_space<vmem>>, vector<64x128xf32>
    %c0_5 = arith.constant 0 : index
    %c0_6 = arith.constant 0 : index
    %4 = vector.load %arg3[%c0_5, %c0_6] : memref<8x32xf32, #tpu.memory_space<vmem>>, vector<8x32xf32>
    %c0_7 = arith.constant 0 : index
    %c0_8 = arith.constant 0 : index
    %5 = vector.load %arg4[%c0_7, %c0_8] : memref<8x64xf32, #tpu.memory_space<vmem>>, vector<8x64xf32>
    %c0_9 = arith.constant 0 : index
    %c0_10 = arith.constant 0 : index
    %6 = vector.load %arg5[%c0_9, %c0_10] : memref<64x32xf32, #tpu.memory_space<vmem>>, vector<64x32xf32>
    %cst_11 = arith.constant 0.000000e+00 : f32
    %7 = vector.broadcast %cst_11 : f32 to vector<8x64xf32>
    %cst_12 = arith.constant 0xFF800000 : f32
    %8 = vector.broadcast %cst_12 : f32 to vector<8x32xf32>
    %9 = vector.extract_strided_slice %2 {offsets = [0, 0], sizes = [8, 128], strides = [1, 1]} : vector<64x128xf32> to vector<8x128xf32>
    %10 = vector.extract_strided_slice %6 {offsets = [0, 0], sizes = [8, 32], strides = [1, 1]} : vector<64x32xf32> to vector<8x32xf32>
    %cst_13 = arith.constant dense<0.000000e+00> : vector<8x128xf32>
    %11 = tpu.matmul %7, %3, %cst_13 {dimension_numbers = #tpu.dot_dimension_numbers<[1], [0], [0], [1], [0, 0, 1, 1], [], []>} : vector<8x64xf32>, vector<64x128xf32>, vector<8x128xf32> -> vector<8x128xf32>
    %12 = vector.extract_strided_slice %9 {offsets = [0, 0], sizes = [8, 32], strides = [1, 1]} : vector<8x128xf32> to vector<8x32xf32>
    %13 = vector.extract_strided_slice %11 {offsets = [0, 0], sizes = [8, 32], strides = [1, 1]} : vector<8x128xf32> to vector<8x32xf32>
    %14 = arith.addf %12, %13 : vector<8x32xf32>
    %15 = arith.negf %14 : vector<8x32xf32>
    %16 = math.exp %15 : vector<8x32xf32>
    %cst_14 = arith.constant 1.000000e+00 : f32
    %17 = vector.broadcast %cst_14 : f32 to vector<8x32xf32>
    %18 = arith.addf %17, %16 : vector<8x32xf32>
    %19 = arith.divf %17, %18 : vector<8x32xf32>
    %20 = vector.extract_strided_slice %9 {offsets = [0, 32], sizes = [8, 32], strides = [1, 1]} : vector<8x128xf32> to vector<8x32xf32>
    %21 = vector.extract_strided_slice %11 {offsets = [0, 32], sizes = [8, 32], strides = [1, 1]} : vector<8x128xf32> to vector<8x32xf32>
    %22 = arith.addf %20, %21 : vector<8x32xf32>
    %23 = arith.negf %22 : vector<8x32xf32>
    %24 = math.exp %23 : vector<8x32xf32>
    %cst_15 = arith.constant 1.000000e+00 : f32
    %25 = vector.broadcast %cst_15 : f32 to vector<8x32xf32>
    %26 = arith.addf %25, %24 : vector<8x32xf32>
    %27 = arith.divf %25, %26 : vector<8x32xf32>
    %28 = vector.extract_strided_slice %9 {offsets = [0, 64], sizes = [8, 32], strides = [1, 1]} : vector<8x128xf32> to vector<8x32xf32>
    %29 = vector.extract_strided_slice %11 {offsets = [0, 64], sizes = [8, 32], strides = [1, 1]} : vector<8x128xf32> to vector<8x32xf32>
    %30 = arith.addf %29, %4 : vector<8x32xf32>
    %31 = arith.mulf %19, %30 : vector<8x32xf32>
    %32 = arith.addf %28, %31 : vector<8x32xf32>
    %33 = math.tanh %32 : vector<8x32xf32>
    %34 = vector.extract_strided_slice %7 {offsets = [0, 0], sizes = [8, 32], strides = [1, 1]} : vector<8x64xf32> to vector<8x32xf32>
    %35 = vector.extract_strided_slice %7 {offsets = [0, 32], sizes = [8, 32], strides = [1, 1]} : vector<8x64xf32> to vector<8x32xf32>
    %36 = arith.addf %34, %35 : vector<8x32xf32>
    %37 = arith.subf %36, %33 : vector<8x32xf32>
    %38 = arith.mulf %27, %37 : vector<8x32xf32>
    %39 = arith.addf %33, %38 : vector<8x32xf32>
    %40 = arith.subf %39, %36 : vector<8x32xf32>
    %41 = arith.mulf %10, %40 : vector<8x32xf32>
    %42 = arith.addf %36, %41 : vector<8x32xf32>
    %43 = math.tanh %39 : vector<8x32xf32>
    %44 = arith.mulf %10, %43 : vector<8x32xf32>
    %45 = arith.maximumf %8, %44 : vector<8x32xf32>
    %46 = tpu.concatenate %42, %42 in 1 : vector<8x32xf32>, vector<8x32xf32> -> vector<8x64xf32>
    %47 = arith.mulf %46, %5 : vector<8x64xf32>
    %48 = vector.extract_strided_slice %2 {offsets = [8, 0], sizes = [8, 128], strides = [1, 1]} : vector<64x128xf32> to vector<8x128xf32>
    %49 = vector.extract_strided_slice %6 {offsets = [8, 0], sizes = [8, 32], strides = [1, 1]} : vector<64x32xf32> to vector<8x32xf32>
    %cst_16 = arith.constant dense<0.000000e+00> : vector<8x128xf32>
    %50 = tpu.matmul %47, %3, %cst_16 {dimension_numbers = #tpu.dot_dimension_numbers<[1], [0], [0], [1], [0, 0, 1, 1], [], []>} : vector<8x64xf32>, vector<64x128xf32>, vector<8x128xf32> -> vector<8x128xf32>
    %51 = vector.extract_strided_slice %48 {offsets = [0, 0], sizes = [8, 32], strides = [1, 1]} : vector<8x128xf32> to vector<8x32xf32>
    %52 = vector.extract_strided_slice %50 {offsets = [0, 0], sizes = [8, 32], strides = [1, 1]} : vector<8x128xf32> to vector<8x32xf32>
    %53 = arith.addf %51, %52 : vector<8x32xf32>
    %54 = arith.negf %53 : vector<8x32xf32>
    %55 = math.exp %54 : vector<8x32xf32>
    %cst_17 = arith.constant 1.000000e+00 : f32
    %56 = vector.broadcast %cst_17 : f32 to vector<8x32xf32>
    %57 = arith.addf %56, %55 : vector<8x32xf32>
    %58 = arith.divf %56, %57 : vector<8x32xf32>
    %59 = vector.extract_strided_slice %48 {offsets = [0, 32], sizes = [8, 32], strides = [1, 1]} : vector<8x128xf32> to vector<8x32xf32>
    %60 = vector.extract_strided_slice %50 {offsets = [0, 32], sizes = [8, 32], strides = [1, 1]} : vector<8x128xf32> to vector<8x32xf32>
    %61 = arith.addf %59, %60 : vector<8x32xf32>
    %62 = arith.negf %61 : vector<8x32xf32>
    %63 = math.exp %62 : vector<8x32xf32>
    %cst_18 = arith.constant 1.000000e+00 : f32
    %64 = vector.broadcast %cst_18 : f32 to vector<8x32xf32>
    %65 = arith.addf %64, %63 : vector<8x32xf32>
    %66 = arith.divf %64, %65 : vector<8x32xf32>
    %67 = vector.extract_strided_slice %48 {offsets = [0, 64], sizes = [8, 32], strides = [1, 1]} : vector<8x128xf32> to vector<8x32xf32>
    %68 = vector.extract_strided_slice %50 {offsets = [0, 64], sizes = [8, 32], strides = [1, 1]} : vector<8x128xf32> to vector<8x32xf32>
    %69 = arith.addf %68, %4 : vector<8x32xf32>
    %70 = arith.mulf %58, %69 : vector<8x32xf32>
    %71 = arith.addf %67, %70 : vector<8x32xf32>
    %72 = math.tanh %71 : vector<8x32xf32>
    %73 = vector.extract_strided_slice %47 {offsets = [0, 0], sizes = [8, 32], strides = [1, 1]} : vector<8x64xf32> to vector<8x32xf32>
    %74 = vector.extract_strided_slice %47 {offsets = [0, 32], sizes = [8, 32], strides = [1, 1]} : vector<8x64xf32> to vector<8x32xf32>
    %75 = arith.addf %73, %74 : vector<8x32xf32>
    %76 = arith.subf %75, %72 : vector<8x32xf32>
    %77 = arith.mulf %66, %76 : vector<8x32xf32>
    %78 = arith.addf %72, %77 : vector<8x32xf32>
    %79 = arith.subf %78, %75 : vector<8x32xf32>
    %80 = arith.mulf %49, %79 : vector<8x32xf32>
    %81 = arith.addf %75, %80 : vector<8x32xf32>
    %82 = math.tanh %78 : vector<8x32xf32>
    %83 = arith.mulf %49, %82 : vector<8x32xf32>
    %84 = arith.maximumf %45, %83 : vector<8x32xf32>
    %85 = tpu.concatenate %81, %81 in 1 : vector<8x32xf32>, vector<8x32xf32> -> vector<8x64xf32>
    %86 = arith.mulf %85, %5 : vector<8x64xf32>
    %87 = vector.extract_strided_slice %2 {offsets = [16, 0], sizes = [8, 128], strides = [1, 1]} : vector<64x128xf32> to vector<8x128xf32>
    %88 = vector.extract_strided_slice %6 {offsets = [16, 0], sizes = [8, 32], strides = [1, 1]} : vector<64x32xf32> to vector<8x32xf32>
    %cst_19 = arith.constant dense<0.000000e+00> : vector<8x128xf32>
    %89 = tpu.matmul %86, %3, %cst_19 {dimension_numbers = #tpu.dot_dimension_numbers<[1], [0], [0], [1], [0, 0, 1, 1], [], []>} : vector<8x64xf32>, vector<64x128xf32>, vector<8x128xf32> -> vector<8x128xf32>
    %90 = vector.extract_strided_slice %87 {offsets = [0, 0], sizes = [8, 32], strides = [1, 1]} : vector<8x128xf32> to vector<8x32xf32>
    %91 = vector.extract_strided_slice %89 {offsets = [0, 0], sizes = [8, 32], strides = [1, 1]} : vector<8x128xf32> to vector<8x32xf32>
    %92 = arith.addf %90, %91 : vector<8x32xf32>
    %93 = arith.negf %92 : vector<8x32xf32>
    %94 = math.exp %93 : vector<8x32xf32>
    %cst_20 = arith.constant 1.000000e+00 : f32
    %95 = vector.broadcast %cst_20 : f32 to vector<8x32xf32>
    %96 = arith.addf %95, %94 : vector<8x32xf32>
    %97 = arith.divf %95, %96 : vector<8x32xf32>
    %98 = vector.extract_strided_slice %87 {offsets = [0, 32], sizes = [8, 32], strides = [1, 1]} : vector<8x128xf32> to vector<8x32xf32>
    %99 = vector.extract_strided_slice %89 {offsets = [0, 32], sizes = [8, 32], strides = [1, 1]} : vector<8x128xf32> to vector<8x32xf32>
    %100 = arith.addf %98, %99 : vector<8x32xf32>
    %101 = arith.negf %100 : vector<8x32xf32>
    %102 = math.exp %101 : vector<8x32xf32>
    %cst_21 = arith.constant 1.000000e+00 : f32
    %103 = vector.broadcast %cst_21 : f32 to vector<8x32xf32>
    %104 = arith.addf %103, %102 : vector<8x32xf32>
    %105 = arith.divf %103, %104 : vector<8x32xf32>
    %106 = vector.extract_strided_slice %87 {offsets = [0, 64], sizes = [8, 32], strides = [1, 1]} : vector<8x128xf32> to vector<8x32xf32>
    %107 = vector.extract_strided_slice %89 {offsets = [0, 64], sizes = [8, 32], strides = [1, 1]} : vector<8x128xf32> to vector<8x32xf32>
    %108 = arith.addf %107, %4 : vector<8x32xf32>
    %109 = arith.mulf %97, %108 : vector<8x32xf32>
    %110 = arith.addf %106, %109 : vector<8x32xf32>
    %111 = math.tanh %110 : vector<8x32xf32>
    %112 = vector.extract_strided_slice %86 {offsets = [0, 0], sizes = [8, 32], strides = [1, 1]} : vector<8x64xf32> to vector<8x32xf32>
    %113 = vector.extract_strided_slice %86 {offsets = [0, 32], sizes = [8, 32], strides = [1, 1]} : vector<8x64xf32> to vector<8x32xf32>
    %114 = arith.addf %112, %113 : vector<8x32xf32>
    %115 = arith.subf %114, %111 : vector<8x32xf32>
    %116 = arith.mulf %105, %115 : vector<8x32xf32>
    %117 = arith.addf %111, %116 : vector<8x32xf32>
    %118 = arith.subf %117, %114 : vector<8x32xf32>
    %119 = arith.mulf %88, %118 : vector<8x32xf32>
    %120 = arith.addf %114, %119 : vector<8x32xf32>
    %121 = math.tanh %117 : vector<8x32xf32>
    %122 = arith.mulf %88, %121 : vector<8x32xf32>
    %123 = arith.maximumf %84, %122 : vector<8x32xf32>
    %124 = tpu.concatenate %120, %120 in 1 : vector<8x32xf32>, vector<8x32xf32> -> vector<8x64xf32>
    %125 = arith.mulf %124, %5 : vector<8x64xf32>
    %126 = vector.extract_strided_slice %2 {offsets = [24, 0], sizes = [8, 128], strides = [1, 1]} : vector<64x128xf32> to vector<8x128xf32>
    %127 = vector.extract_strided_slice %6 {offsets = [24, 0], sizes = [8, 32], strides = [1, 1]} : vector<64x32xf32> to vector<8x32xf32>
    %cst_22 = arith.constant dense<0.000000e+00> : vector<8x128xf32>
    %128 = tpu.matmul %125, %3, %cst_22 {dimension_numbers = #tpu.dot_dimension_numbers<[1], [0], [0], [1], [0, 0, 1, 1], [], []>} : vector<8x64xf32>, vector<64x128xf32>, vector<8x128xf32> -> vector<8x128xf32>
    %129 = vector.extract_strided_slice %126 {offsets = [0, 0], sizes = [8, 32], strides = [1, 1]} : vector<8x128xf32> to vector<8x32xf32>
    %130 = vector.extract_strided_slice %128 {offsets = [0, 0], sizes = [8, 32], strides = [1, 1]} : vector<8x128xf32> to vector<8x32xf32>
    %131 = arith.addf %129, %130 : vector<8x32xf32>
    %132 = arith.negf %131 : vector<8x32xf32>
    %133 = math.exp %132 : vector<8x32xf32>
    %cst_23 = arith.constant 1.000000e+00 : f32
    %134 = vector.broadcast %cst_23 : f32 to vector<8x32xf32>
    %135 = arith.addf %134, %133 : vector<8x32xf32>
    %136 = arith.divf %134, %135 : vector<8x32xf32>
    %137 = vector.extract_strided_slice %126 {offsets = [0, 32], sizes = [8, 32], strides = [1, 1]} : vector<8x128xf32> to vector<8x32xf32>
    %138 = vector.extract_strided_slice %128 {offsets = [0, 32], sizes = [8, 32], strides = [1, 1]} : vector<8x128xf32> to vector<8x32xf32>
    %139 = arith.addf %137, %138 : vector<8x32xf32>
    %140 = arith.negf %139 : vector<8x32xf32>
    %141 = math.exp %140 : vector<8x32xf32>
    %cst_24 = arith.constant 1.000000e+00 : f32
    %142 = vector.broadcast %cst_24 : f32 to vector<8x32xf32>
    %143 = arith.addf %142, %141 : vector<8x32xf32>
    %144 = arith.divf %142, %143 : vector<8x32xf32>
    %145 = vector.extract_strided_slice %126 {offsets = [0, 64], sizes = [8, 32], strides = [1, 1]} : vector<8x128xf32> to vector<8x32xf32>
    %146 = vector.extract_strided_slice %128 {offsets = [0, 64], sizes = [8, 32], strides = [1, 1]} : vector<8x128xf32> to vector<8x32xf32>
    %147 = arith.addf %146, %4 : vector<8x32xf32>
    %148 = arith.mulf %136, %147 : vector<8x32xf32>
    %149 = arith.addf %145, %148 : vector<8x32xf32>
    %150 = math.tanh %149 : vector<8x32xf32>
    %151 = vector.extract_strided_slice %125 {offsets = [0, 0], sizes = [8, 32], strides = [1, 1]} : vector<8x64xf32> to vector<8x32xf32>
    %152 = vector.extract_strided_slice %125 {offsets = [0, 32], sizes = [8, 32], strides = [1, 1]} : vector<8x64xf32> to vector<8x32xf32>
    %153 = arith.addf %151, %152 : vector<8x32xf32>
    %154 = arith.subf %153, %150 : vector<8x32xf32>
    %155 = arith.mulf %144, %154 : vector<8x32xf32>
    %156 = arith.addf %150, %155 : vector<8x32xf32>
    %157 = arith.subf %156, %153 : vector<8x32xf32>
    %158 = arith.mulf %127, %157 : vector<8x32xf32>
    %159 = arith.addf %153, %158 : vector<8x32xf32>
    %160 = math.tanh %156 : vector<8x32xf32>
    %161 = arith.mulf %127, %160 : vector<8x32xf32>
    %162 = arith.maximumf %123, %161 : vector<8x32xf32>
    %163 = tpu.concatenate %159, %159 in 1 : vector<8x32xf32>, vector<8x32xf32> -> vector<8x64xf32>
    %164 = arith.mulf %163, %5 : vector<8x64xf32>
    %165 = vector.extract_strided_slice %2 {offsets = [32, 0], sizes = [8, 128], strides = [1, 1]} : vector<64x128xf32> to vector<8x128xf32>
    %166 = vector.extract_strided_slice %6 {offsets = [32, 0], sizes = [8, 32], strides = [1, 1]} : vector<64x32xf32> to vector<8x32xf32>
    %cst_25 = arith.constant dense<0.000000e+00> : vector<8x128xf32>
    %167 = tpu.matmul %164, %3, %cst_25 {dimension_numbers = #tpu.dot_dimension_numbers<[1], [0], [0], [1], [0, 0, 1, 1], [], []>} : vector<8x64xf32>, vector<64x128xf32>, vector<8x128xf32> -> vector<8x128xf32>
    %168 = vector.extract_strided_slice %165 {offsets = [0, 0], sizes = [8, 32], strides = [1, 1]} : vector<8x128xf32> to vector<8x32xf32>
    %169 = vector.extract_strided_slice %167 {offsets = [0, 0], sizes = [8, 32], strides = [1, 1]} : vector<8x128xf32> to vector<8x32xf32>
    %170 = arith.addf %168, %169 : vector<8x32xf32>
    %171 = arith.negf %170 : vector<8x32xf32>
    %172 = math.exp %171 : vector<8x32xf32>
    %cst_26 = arith.constant 1.000000e+00 : f32
    %173 = vector.broadcast %cst_26 : f32 to vector<8x32xf32>
    %174 = arith.addf %173, %172 : vector<8x32xf32>
    %175 = arith.divf %173, %174 : vector<8x32xf32>
    %176 = vector.extract_strided_slice %165 {offsets = [0, 32], sizes = [8, 32], strides = [1, 1]} : vector<8x128xf32> to vector<8x32xf32>
    %177 = vector.extract_strided_slice %167 {offsets = [0, 32], sizes = [8, 32], strides = [1, 1]} : vector<8x128xf32> to vector<8x32xf32>
    %178 = arith.addf %176, %177 : vector<8x32xf32>
    %179 = arith.negf %178 : vector<8x32xf32>
    %180 = math.exp %179 : vector<8x32xf32>
    %cst_27 = arith.constant 1.000000e+00 : f32
    %181 = vector.broadcast %cst_27 : f32 to vector<8x32xf32>
    %182 = arith.addf %181, %180 : vector<8x32xf32>
    %183 = arith.divf %181, %182 : vector<8x32xf32>
    %184 = vector.extract_strided_slice %165 {offsets = [0, 64], sizes = [8, 32], strides = [1, 1]} : vector<8x128xf32> to vector<8x32xf32>
    %185 = vector.extract_strided_slice %167 {offsets = [0, 64], sizes = [8, 32], strides = [1, 1]} : vector<8x128xf32> to vector<8x32xf32>
    %186 = arith.addf %185, %4 : vector<8x32xf32>
    %187 = arith.mulf %175, %186 : vector<8x32xf32>
    %188 = arith.addf %184, %187 : vector<8x32xf32>
    %189 = math.tanh %188 : vector<8x32xf32>
    %190 = vector.extract_strided_slice %164 {offsets = [0, 0], sizes = [8, 32], strides = [1, 1]} : vector<8x64xf32> to vector<8x32xf32>
    %191 = vector.extract_strided_slice %164 {offsets = [0, 32], sizes = [8, 32], strides = [1, 1]} : vector<8x64xf32> to vector<8x32xf32>
    %192 = arith.addf %190, %191 : vector<8x32xf32>
    %193 = arith.subf %192, %189 : vector<8x32xf32>
    %194 = arith.mulf %183, %193 : vector<8x32xf32>
    %195 = arith.addf %189, %194 : vector<8x32xf32>
    %196 = arith.subf %195, %192 : vector<8x32xf32>
    %197 = arith.mulf %166, %196 : vector<8x32xf32>
    %198 = arith.addf %192, %197 : vector<8x32xf32>
    %199 = math.tanh %195 : vector<8x32xf32>
    %200 = arith.mulf %166, %199 : vector<8x32xf32>
    %201 = arith.maximumf %162, %200 : vector<8x32xf32>
    %202 = tpu.concatenate %198, %198 in 1 : vector<8x32xf32>, vector<8x32xf32> -> vector<8x64xf32>
    %203 = arith.mulf %202, %5 : vector<8x64xf32>
    %204 = vector.extract_strided_slice %2 {offsets = [40, 0], sizes = [8, 128], strides = [1, 1]} : vector<64x128xf32> to vector<8x128xf32>
    %205 = vector.extract_strided_slice %6 {offsets = [40, 0], sizes = [8, 32], strides = [1, 1]} : vector<64x32xf32> to vector<8x32xf32>
    %cst_28 = arith.constant dense<0.000000e+00> : vector<8x128xf32>
    %206 = tpu.matmul %203, %3, %cst_28 {dimension_numbers = #tpu.dot_dimension_numbers<[1], [0], [0], [1], [0, 0, 1, 1], [], []>} : vector<8x64xf32>, vector<64x128xf32>, vector<8x128xf32> -> vector<8x128xf32>
    %207 = vector.extract_strided_slice %204 {offsets = [0, 0], sizes = [8, 32], strides = [1, 1]} : vector<8x128xf32> to vector<8x32xf32>
    %208 = vector.extract_strided_slice %206 {offsets = [0, 0], sizes = [8, 32], strides = [1, 1]} : vector<8x128xf32> to vector<8x32xf32>
    %209 = arith.addf %207, %208 : vector<8x32xf32>
    %210 = arith.negf %209 : vector<8x32xf32>
    %211 = math.exp %210 : vector<8x32xf32>
    %cst_29 = arith.constant 1.000000e+00 : f32
    %212 = vector.broadcast %cst_29 : f32 to vector<8x32xf32>
    %213 = arith.addf %212, %211 : vector<8x32xf32>
    %214 = arith.divf %212, %213 : vector<8x32xf32>
    %215 = vector.extract_strided_slice %204 {offsets = [0, 32], sizes = [8, 32], strides = [1, 1]} : vector<8x128xf32> to vector<8x32xf32>
    %216 = vector.extract_strided_slice %206 {offsets = [0, 32], sizes = [8, 32], strides = [1, 1]} : vector<8x128xf32> to vector<8x32xf32>
    %217 = arith.addf %215, %216 : vector<8x32xf32>
    %218 = arith.negf %217 : vector<8x32xf32>
    %219 = math.exp %218 : vector<8x32xf32>
    %cst_30 = arith.constant 1.000000e+00 : f32
    %220 = vector.broadcast %cst_30 : f32 to vector<8x32xf32>
    %221 = arith.addf %220, %219 : vector<8x32xf32>
    %222 = arith.divf %220, %221 : vector<8x32xf32>
    %223 = vector.extract_strided_slice %204 {offsets = [0, 64], sizes = [8, 32], strides = [1, 1]} : vector<8x128xf32> to vector<8x32xf32>
    %224 = vector.extract_strided_slice %206 {offsets = [0, 64], sizes = [8, 32], strides = [1, 1]} : vector<8x128xf32> to vector<8x32xf32>
    %225 = arith.addf %224, %4 : vector<8x32xf32>
    %226 = arith.mulf %214, %225 : vector<8x32xf32>
    %227 = arith.addf %223, %226 : vector<8x32xf32>
    %228 = math.tanh %227 : vector<8x32xf32>
    %229 = vector.extract_strided_slice %203 {offsets = [0, 0], sizes = [8, 32], strides = [1, 1]} : vector<8x64xf32> to vector<8x32xf32>
    %230 = vector.extract_strided_slice %203 {offsets = [0, 32], sizes = [8, 32], strides = [1, 1]} : vector<8x64xf32> to vector<8x32xf32>
    %231 = arith.addf %229, %230 : vector<8x32xf32>
    %232 = arith.subf %231, %228 : vector<8x32xf32>
    %233 = arith.mulf %222, %232 : vector<8x32xf32>
    %234 = arith.addf %228, %233 : vector<8x32xf32>
    %235 = arith.subf %234, %231 : vector<8x32xf32>
    %236 = arith.mulf %205, %235 : vector<8x32xf32>
    %237 = arith.addf %231, %236 : vector<8x32xf32>
    %238 = math.tanh %234 : vector<8x32xf32>
    %239 = arith.mulf %205, %238 : vector<8x32xf32>
    %240 = arith.maximumf %201, %239 : vector<8x32xf32>
    %241 = tpu.concatenate %237, %237 in 1 : vector<8x32xf32>, vector<8x32xf32> -> vector<8x64xf32>
    %242 = arith.mulf %241, %5 : vector<8x64xf32>
    %243 = vector.extract_strided_slice %2 {offsets = [48, 0], sizes = [8, 128], strides = [1, 1]} : vector<64x128xf32> to vector<8x128xf32>
    %244 = vector.extract_strided_slice %6 {offsets = [48, 0], sizes = [8, 32], strides = [1, 1]} : vector<64x32xf32> to vector<8x32xf32>
    %cst_31 = arith.constant dense<0.000000e+00> : vector<8x128xf32>
    %245 = tpu.matmul %242, %3, %cst_31 {dimension_numbers = #tpu.dot_dimension_numbers<[1], [0], [0], [1], [0, 0, 1, 1], [], []>} : vector<8x64xf32>, vector<64x128xf32>, vector<8x128xf32> -> vector<8x128xf32>
    %246 = vector.extract_strided_slice %243 {offsets = [0, 0], sizes = [8, 32], strides = [1, 1]} : vector<8x128xf32> to vector<8x32xf32>
    %247 = vector.extract_strided_slice %245 {offsets = [0, 0], sizes = [8, 32], strides = [1, 1]} : vector<8x128xf32> to vector<8x32xf32>
    %248 = arith.addf %246, %247 : vector<8x32xf32>
    %249 = arith.negf %248 : vector<8x32xf32>
    %250 = math.exp %249 : vector<8x32xf32>
    %cst_32 = arith.constant 1.000000e+00 : f32
    %251 = vector.broadcast %cst_32 : f32 to vector<8x32xf32>
    %252 = arith.addf %251, %250 : vector<8x32xf32>
    %253 = arith.divf %251, %252 : vector<8x32xf32>
    %254 = vector.extract_strided_slice %243 {offsets = [0, 32], sizes = [8, 32], strides = [1, 1]} : vector<8x128xf32> to vector<8x32xf32>
    %255 = vector.extract_strided_slice %245 {offsets = [0, 32], sizes = [8, 32], strides = [1, 1]} : vector<8x128xf32> to vector<8x32xf32>
    %256 = arith.addf %254, %255 : vector<8x32xf32>
    %257 = arith.negf %256 : vector<8x32xf32>
    %258 = math.exp %257 : vector<8x32xf32>
    %cst_33 = arith.constant 1.000000e+00 : f32
    %259 = vector.broadcast %cst_33 : f32 to vector<8x32xf32>
    %260 = arith.addf %259, %258 : vector<8x32xf32>
    %261 = arith.divf %259, %260 : vector<8x32xf32>
    %262 = vector.extract_strided_slice %243 {offsets = [0, 64], sizes = [8, 32], strides = [1, 1]} : vector<8x128xf32> to vector<8x32xf32>
    %263 = vector.extract_strided_slice %245 {offsets = [0, 64], sizes = [8, 32], strides = [1, 1]} : vector<8x128xf32> to vector<8x32xf32>
    %264 = arith.addf %263, %4 : vector<8x32xf32>
    %265 = arith.mulf %253, %264 : vector<8x32xf32>
    %266 = arith.addf %262, %265 : vector<8x32xf32>
    %267 = math.tanh %266 : vector<8x32xf32>
    %268 = vector.extract_strided_slice %242 {offsets = [0, 0], sizes = [8, 32], strides = [1, 1]} : vector<8x64xf32> to vector<8x32xf32>
    %269 = vector.extract_strided_slice %242 {offsets = [0, 32], sizes = [8, 32], strides = [1, 1]} : vector<8x64xf32> to vector<8x32xf32>
    %270 = arith.addf %268, %269 : vector<8x32xf32>
    %271 = arith.subf %270, %267 : vector<8x32xf32>
    %272 = arith.mulf %261, %271 : vector<8x32xf32>
    %273 = arith.addf %267, %272 : vector<8x32xf32>
    %274 = arith.subf %273, %270 : vector<8x32xf32>
    %275 = arith.mulf %244, %274 : vector<8x32xf32>
    %276 = arith.addf %270, %275 : vector<8x32xf32>
    %277 = math.tanh %273 : vector<8x32xf32>
    %278 = arith.mulf %244, %277 : vector<8x32xf32>
    %279 = arith.maximumf %240, %278 : vector<8x32xf32>
    %280 = tpu.concatenate %276, %276 in 1 : vector<8x32xf32>, vector<8x32xf32> -> vector<8x64xf32>
    %281 = arith.mulf %280, %5 : vector<8x64xf32>
    %282 = vector.extract_strided_slice %2 {offsets = [56, 0], sizes = [8, 128], strides = [1, 1]} : vector<64x128xf32> to vector<8x128xf32>
    %283 = vector.extract_strided_slice %6 {offsets = [56, 0], sizes = [8, 32], strides = [1, 1]} : vector<64x32xf32> to vector<8x32xf32>
    %cst_34 = arith.constant dense<0.000000e+00> : vector<8x128xf32>
    %284 = tpu.matmul %281, %3, %cst_34 {dimension_numbers = #tpu.dot_dimension_numbers<[1], [0], [0], [1], [0, 0, 1, 1], [], []>} : vector<8x64xf32>, vector<64x128xf32>, vector<8x128xf32> -> vector<8x128xf32>
    %285 = vector.extract_strided_slice %282 {offsets = [0, 0], sizes = [8, 32], strides = [1, 1]} : vector<8x128xf32> to vector<8x32xf32>
    %286 = vector.extract_strided_slice %284 {offsets = [0, 0], sizes = [8, 32], strides = [1, 1]} : vector<8x128xf32> to vector<8x32xf32>
    %287 = arith.addf %285, %286 : vector<8x32xf32>
    %288 = arith.negf %287 : vector<8x32xf32>
    %289 = math.exp %288 : vector<8x32xf32>
    %cst_35 = arith.constant 1.000000e+00 : f32
    %290 = vector.broadcast %cst_35 : f32 to vector<8x32xf32>
    %291 = arith.addf %290, %289 : vector<8x32xf32>
    %292 = arith.divf %290, %291 : vector<8x32xf32>
    %293 = vector.extract_strided_slice %282 {offsets = [0, 32], sizes = [8, 32], strides = [1, 1]} : vector<8x128xf32> to vector<8x32xf32>
    %294 = vector.extract_strided_slice %284 {offsets = [0, 32], sizes = [8, 32], strides = [1, 1]} : vector<8x128xf32> to vector<8x32xf32>
    %295 = arith.addf %293, %294 : vector<8x32xf32>
    %296 = arith.negf %295 : vector<8x32xf32>
    %297 = math.exp %296 : vector<8x32xf32>
    %cst_36 = arith.constant 1.000000e+00 : f32
    %298 = vector.broadcast %cst_36 : f32 to vector<8x32xf32>
    %299 = arith.addf %298, %297 : vector<8x32xf32>
    %300 = arith.divf %298, %299 : vector<8x32xf32>
    %301 = vector.extract_strided_slice %282 {offsets = [0, 64], sizes = [8, 32], strides = [1, 1]} : vector<8x128xf32> to vector<8x32xf32>
    %302 = vector.extract_strided_slice %284 {offsets = [0, 64], sizes = [8, 32], strides = [1, 1]} : vector<8x128xf32> to vector<8x32xf32>
    %303 = arith.addf %302, %4 : vector<8x32xf32>
    %304 = arith.mulf %292, %303 : vector<8x32xf32>
    %305 = arith.addf %301, %304 : vector<8x32xf32>
    %306 = math.tanh %305 : vector<8x32xf32>
    %307 = vector.extract_strided_slice %281 {offsets = [0, 0], sizes = [8, 32], strides = [1, 1]} : vector<8x64xf32> to vector<8x32xf32>
    %308 = vector.extract_strided_slice %281 {offsets = [0, 32], sizes = [8, 32], strides = [1, 1]} : vector<8x64xf32> to vector<8x32xf32>
    %309 = arith.addf %307, %308 : vector<8x32xf32>
    %310 = arith.subf %309, %306 : vector<8x32xf32>
    %311 = arith.mulf %300, %310 : vector<8x32xf32>
    %312 = arith.addf %306, %311 : vector<8x32xf32>
    %313 = math.tanh %312 : vector<8x32xf32>
    %314 = arith.mulf %283, %313 : vector<8x32xf32>
    %315 = arith.maximumf %279, %314 : vector<8x32xf32>
    %316 = math.tanh %315 : vector<8x32xf32>
    %317 = vector.extract_strided_slice %316 {offsets = [0, 0], sizes = [4, 32], strides = [1, 1]} : vector<8x32xf32> to vector<4x32xf32>
    %318 = vector.extract_strided_slice %316 {offsets = [4, 0], sizes = [4, 32], strides = [1, 1]} : vector<8x32xf32> to vector<4x32xf32>
    %319 = tpu.concatenate %317, %318 in 1 : vector<4x32xf32>, vector<4x32xf32> -> vector<4x64xf32>
    %c0_37 = arith.constant 0 : index
    %c0_38 = arith.constant 0 : index
    %320 = vector.load %arg6[%c0_37, %c0_38] : memref<64x128xf32, #tpu.memory_space<vmem>>, vector<64x128xf32>
    %cst_39 = arith.constant dense<0.000000e+00> : vector<4x128xf32>
    %321 = tpu.matmul %319, %320, %cst_39 {dimension_numbers = #tpu.dot_dimension_numbers<[1], [0], [0], [1], [0, 0, 1, 1], [], []>} : vector<4x64xf32>, vector<64x128xf32>, vector<4x128xf32> -> vector<4x128xf32>
    %c0_40 = arith.constant 0 : index
    %c0_41 = arith.constant 0 : index
    %322 = vector.load %arg7[%c0_40, %c0_41] : memref<1x128xf32, #tpu.memory_space<vmem>>, vector<1x128xf32>
    %323 = vector.broadcast %322 : vector<1x128xf32> to vector<4x128xf32>
    %324 = arith.addf %321, %323 : vector<4x128xf32>
    %c0_42 = arith.constant 0 : index
    %c0_43 = arith.constant 0 : index
    %325 = vector.load %arg8[%c0_42, %c0_43] : memref<4x128xf32, #tpu.memory_space<vmem>>, vector<4x128xf32>
    tpu.vector_store %arg8[%c0_42, %c0_43], %324 {strides = array<i32>} : memref<4x128xf32, #tpu.memory_space<vmem>>, vector<4x128xf32>,
    return
  }
}

</mosaic_0001>

<bundles_post_ra>
// kernel: tpu_custom_call.1
= control target key start
LH: loop header
LB: loop body
LE: loop exit
PB: predicated region body
PF: predicated region fallthrough
CT: control target
= control target key end

     0   :  { %13 = vsyncpa [#allocation3], 0  ;;  %s2490_s0 = inlined_call_operand.vmem [shape: f32[64,128], index: 0, kind: input, shape index: {}]   ;;  %s2491_s1 = inlined_call_operand.hbm [shape: f32[128,128], index: 1, kind: input, shape index: {}]   ;;  %s2492_s2 = inlined_call_operand.hbm [shape: f32[64,128], index: 2, kind: input, shape index: {}]   ;;  %s2493_s3 = inlined_call_operand.vmem [shape: f32[8,32], index: 3, kind: input, shape index: {}]   ;;  %s2494_s4 = inlined_call_operand.vmem [shape: f32[8,64], index: 4, kind: input, shape index: {}]   ;;  %s2495_s5 = inlined_call_operand.vmem [shape: f32[64,32], index: 5, kind: input, shape index: {}]   ;;  %s2496_s6 = inlined_call_operand.hbm [shape: f32[64,128], index: 6, kind: input, shape index: {}]   ;;  %s2497_s7 = inlined_call_operand.vmem [shape: f32[1,128], index: 7, kind: input, shape index: {}]   ;;  %s2498_s8 = inlined_call_operand.hbm [shape: f32[4,128], index: 8, kind: output, shape index: {}]  }
   0x1   :  { %14 = vsyncpa [#allocation6], 0 }
   0x2   :  { %15 = vsyncpa [#allocation4], 0  ;;  %s2034_s27 = smov [#allocation5]   ;;  %s2035_s29 = smov [#allocation2]  }
   0x3   :  { %s35_s28 = sshll.u32 %s2034_s27, 4  ;;  %s23_s30 = sshll.u32 %s2035_s29, 4  ;;  %s36_s28 = int_to_ptr.vmem [resolvable:$true] %s35_s28  ;;  %s2091_s30 = int_to_ptr.vmem [resolvable:$true] %s23_s30 }
   0x4   :  { %s1940_s11 = scalar_lea.hbm %s2492_s2, 1024 }
   0x5   :  { %p1941_p0 = scmp.ne.s32.totalorder %s2492_s2, %s1940_s11  ;;  %p1944_p1 = scmp.lt.u32.totalorder %s1940_s11, %s2492_s2 }
   0x7   :  { %p1946_p2 = pnand %p1944_p1, %p1941_p0 }
   0x9   :  { %1949 = shalt.err (!%p1946_p2)
}
   0xa   :  { %s1950_s16 = scalar_lea.vmem %s36_s28, 1024  ;;  %p1955_p4 = scmp.lt.s32.totalorder %s36_s28, %s36_s28 }
   0xb   :  { %p1951_p3 = scmp.ne.s32.totalorder %s36_s28, %s1950_s16  ;;  %p1956_p5 = scmp.lt.s32.totalorder %s1950_s16, %s1950_s16 }
   0xd   :  { %p1957_p6 = por %p1956_p5, %p1955_p4 }
   0xf   :  { %p1958_p7 = pnand %p1957_p6, %p1951_p3 }
  0x11   :  { %1961 = shalt.err (!%p1958_p7)
}
  0x12   :  { %s2036_s17 = smov 128   ;;  %s2037_s18 = smov 8  }
  0x13   :  { %41 = dma.hbm_to_vmem [thread:$0]  %s2492_s2, 1024, %s36_s28, [#allocation6], %s2036_s17, %s2036_s17, %s2037_s18  }
  0x14   :  { %s1962_s23 = scalar_lea.hbm %s2491_s1, 2048 }
  0x15   :  { %p1963_p8 = scmp.ne.s32.totalorder %s2491_s1, %s1962_s23  ;;  %p1966_p9 = scmp.lt.u32.totalorder %s1962_s23, %s2491_s1 }
  0x17   :  { %p1968_p10 = pnand %p1966_p9, %p1963_p8 }
  0x19   :  { %1971 = shalt.err (!%p1968_p10)
}
  0x1a   :  { %s1972_s29 = scalar_lea.vmem %s2091_s30, 2048  ;;  %p1977_p12 = scmp.lt.s32.totalorder %s2091_s30, %s2091_s30 }
  0x1b   :  { %p1973_p11 = scmp.ne.s32.totalorder %s2091_s30, %s1972_s29  ;;  %p1978_p13 = scmp.lt.s32.totalorder %s1972_s29, %s1972_s29 }
  0x1d   :  { %p1979_p0 = por %p1978_p13, %p1977_p12 }
  0x1f   :  { %p1980_p1 = pnand %p1979_p0, %p1973_p11 }
  0x21   :  { %1983 = shalt.err (!%p1980_p1)
}
  0x22   :  { %29 = dma.hbm_to_vmem [thread:$0]  %s2491_s1, 2048, %s2091_s30, [#allocation3], %s2036_s17, %s2036_s17, %s2037_s18  }
  0x23   :  { %s2038_s9 = smov [#allocation7]   ;;  %s1984_s13 = scalar_lea.hbm %s2496_s6, 1024 }
  0x24   :  { %s53_s10 = sshll.u32 %s2038_s9, 4  ;;  %p1985_p2 = scmp.ne.s32.totalorder %s2496_s6, %s1984_s13  ;;  %s54_s10 = int_to_ptr.vmem [resolvable:$true] %s53_s10 }
  0x25   :  { %p1988_p3 = scmp.lt.u32.totalorder %s1984_s13, %s2496_s6 }
  0x27   :  { %p1990_p4 = pnand %p1988_p3, %p1985_p2 }
  0x29   :  { %1993 = shalt.err (!%p1990_p4)
}
  0x2a   :  { %s1994_s20 = scalar_lea.vmem %s54_s10, 1024  ;;  %p1999_p6 = scmp.lt.s32.totalorder %s54_s10, %s54_s10 }
  0x2b   :  { %p1995_p5 = scmp.ne.s32.totalorder %s54_s10, %s1994_s20  ;;  %p2000_p7 = scmp.lt.s32.totalorder %s1994_s20, %s1994_s20 }
  0x2d   :  { %p2001_p8 = por %p2000_p7, %p1999_p6 }
  0x2f   :  { %p2002_p9 = pnand %p2001_p8, %p1995_p5 }
  0x31   :  { %2005 = shalt.err (!%p2002_p9)
}
  0x32   :  { %59 = dma.hbm_to_vmem [thread:$0]  %s2496_s6, 1024, %s54_s10, [#allocation6], %s2036_s17, %s2036_s17, %s2037_s18  }
  0x33   :  { %2028 = dma.done.wait [#allocation3], 2048  }
  0x34   :  { %2029 = vsyncadd [#allocation3], 4294965248 }
  0x35   :  { %2030 = dma.done.wait [#allocation6], 2048  }
  0x36   :  { %2031 = vsyncadd [#allocation6], 4294965248  ;;  %v2039_v0 = vmov 0.0|0.0   ;;  %vm2040_vm0 = vmmov 0   ;;  %v2041_v1 = vmov 0.0   ;;  %v79_v2 = vld [vmem:[#allocation2] sm:$0xff] }
  0x37   :  { %1754 = vmatprep.subr.bf16.mxu1 %v2039_v0  ;;  %1567 = vmatprep.mubr.msk.f32.mxu1 %vm2040_vm0, %v2041_v1  ;;  %v80_v3 = vld [vmem:[#allocation2 + $0x8] sm:$0xff]  ;;  %v200_v4 = vld [vmem:[#allocation5] sm:$0xff]  ;;  %v81_v7 = vld [vmem:[#allocation2 + $0x10] sm:$0xff]  ;;  %s2042_s22 = smov 64   ;;  %s2043_s24 = smov 96   ;;  %vm342_vm1 = vcmask 261120  }
  0x38   :  { %v1722_v5 = vpack.c.bf16 %v80_v3, %v79_v2  ;;  %v201_v6 = vld [vmem:[#allocation5 + $0x8] sm:$0xff]  ;;  %v82_v8 = vld [vmem:[#allocation2 + $0x18] sm:$0xff]  ;;  %v202_v11 = vld [vmem:[#allocation5 + $0x10] sm:$0xff]  ;;  %s2044_s25 = smov 32   ;;  %vm218_vm2 = vcmask 523264  }
  0x39   :  { %v2146_v9 = vpack.c.bf16 %v201_v6, %v200_v4  ;;  %v1726_v10 = vpack.c.bf16 %v82_v8, %v81_v7  ;;  %v203_v12 = vld [vmem:[#allocation5 + $0x18] sm:$0xff]  ;;  %v83_v13 = vld [vmem:[#allocation2 + $0x20] sm:$0xff]  ;;  %v84_v14 = vld [vmem:[#allocation2 + $0x28] sm:$0xff] }
  0x3a   :  { %1723 = vmatprep.subr.bf16.mxu0 %v1722_v5  ;;  %v2149_v15 = vpack.c.bf16 %v203_v12, %v202_v11  ;;  %v1730_v16 = vpack.c.bf16 %v84_v14, %v83_v13  ;;  %v204_v17 = vld [vmem:[#allocation5 + $0x20] sm:$0xff]  ;;  %v205_v18 = vld [vmem:[#allocation5 + $0x28] sm:$0xff]  ;;  %v85_v19 = vld [vmem:[#allocation2 + $0x30] sm:$0xff] }
  0x3b   :  { %1756 = vmatpush3.bf16.msra.mxu1 %v2146_v9  ;;  %1725 = vmatpush3.bf16.msra.mxu0 %v1722_v5  ;;  %v86_v20 = vld [vmem:[#allocation2 + $0x38] sm:$0xff]  ;;  %v2153_v21 = vpack.c.bf16 %v205_v18, %v204_v17  ;;  %v71_v22 = vld [vmem:[%s2490_s0] sm:$0xff]  ;;  %v206_v25 = vld [vmem:[#allocation5 + $0x30] sm:$0xff] }
  0x3c   :  { %1757 = vmatprep.subr.bf16.mxu1 %v2039_v0  ;;  %1727 = vmatprep.subr.bf16.mxu0 %v1726_v10  ;;  %v208_v23 = vld [vmem:[%s2493_s3] sm:$0xff]  ;;  %v1734_v24 = vpack.c.bf16 %v86_v20, %v85_v19  ;;  %v207_v26 = vld [vmem:[#allocation5 + $0x38] sm:$0xff]  ;;  %v88_v28 = vld [vmem:[#allocation2 + $0x48] sm:$0xff] }
  0x3d   :  { %v87_v27 = vld [vmem:[#allocation2 + $0x40] sm:$0xff]  ;;  %1539 = vmatprep.mubr.f32.mxu0 %v71_v22  ;;  %300 = vrot.lane.b32.xlu0 %v208_v23, %s2042_s22  ;;  %v2164_v29 = vpack.c.bf16 %v207_v26, %v206_v25  ;;  %v89_v31 = vld [vmem:[#allocation2 + $0x50] sm:$0xff]  ;;  %v90_v32 = vld [vmem:[#allocation2 + $0x58] sm:$0xff] }
  0x3e   :  { %v1738_v30 = vpack.c.bf16 %v88_v28, %v87_v27  ;;  %v1742_v33 = vpack.c.bf16 %v90_v32, %v89_v31  ;;  %v91_v34 = vld [vmem:[#allocation2 + $0x60] sm:$0xff]  ;;  %v92_v35 = vld [vmem:[#allocation2 + $0x68] sm:$0xff]  ;;  %v93_v37 = vld [vmem:[#allocation2 + $0x70] sm:$0xff] }
  0x3f   :  { %1759 = vmatpush3.bf16.msra.mxu1 %v2149_v15  ;;  %1729 = vmatpush3.bf16.msra.mxu0 %v1726_v10  ;;  %v1746_v36 = vpack.c.bf16 %v92_v35, %v91_v34  ;;  %v94_v38 = vld [vmem:[#allocation2 + $0x78] sm:$0xff]  ;;  %v72_v40 = vld [vmem:[%s2490_s0 + $0x8] sm:$0xff]  ;;  %v2206_v62 = vld [vmem:[%s2495_s5] sm:$0xff] }
  0x40   :  { %1760 = vmatprep.subr.bf16.mxu1 %v2039_v0  ;;  %1731 = vmatprep.subr.bf16.mxu0 %v1730_v16  ;;  %v1750_v39 = vpack.c.bf16 %v94_v38, %v93_v37  ;;  %v2213_v3 = vld [vmem:[%s2494_s4] sm:$0xff]  ;;  %v74_v31 = vld [vmem:[%s2490_s0 + $0x18] sm:$0xff]  ;;  %v77_v35 = vld [vmem:[%s2490_s0 + $0x30] sm:$0xff] }
  0x41   :  { %v75_v32 = vld [vmem:[%s2490_s0 + $0x20] sm:$0xff] }
  0x43   :  { %1762 = vmatpush3.bf16.msra.mxu1 %v2153_v21  ;;  %1733 = vmatpush3.bf16.msra.mxu0 %v1730_v16 }
  0x44   :  { %1763 = vmatprep.subr.bf16.mxu1 %v2039_v0  ;;  %1735 = vmatprep.subr.bf16.mxu0 %v1734_v24 }
  0x47   :  { %1765 = vmatpush3.bf16.msra.mxu1 %v2164_v29  ;;  %1737 = vmatpush3.bf16.msra.mxu0 %v1734_v24 }
  0x48   :  { %1739 = vmatprep.subr.bf16.mxu0 %v1738_v30  ;;  %1766 = vmatprep.subr.bf16.mxu1 %v2039_v0 }
  0x4a   :  { %1568 = vmatmul.mubr.f32.vlgmr.msra.gmra.mrb[0].mxu1 %v2041_v1 }
  0x4b   :  { %1741 = vmatpush3.bf16.msra.mxu0 %v1738_v30  ;;  %1768 = vmatpush3.bf16.msra.mxu1 %v2146_v9  ;;  %v73_v30 = vld [vmem:[%s2490_s0 + $0x10] sm:$0xff] }
  0x4c   :  { %1743 = vmatprep.subr.bf16.mxu0 %v1742_v33  ;;  %1769 = vmatprep.subr.bf16.mxu1 %v2039_v0 }
  0x4d   :  { %1586 = vmatprep.mubr.msk.f32.mxu1 %vm2040_vm0, %v2041_v1 }
  0x4f   :  { %1745 = vmatpush3.bf16.msra.mxu0 %v1742_v33  ;;  %1771 = vmatpush3.bf16.msra.mxu1 %v2149_v15  ;;  %v76_v33 = vld [vmem:[%s2490_s0 + $0x28] sm:$0xff] }
  0x50   :  { %1747 = vmatprep.subr.bf16.mxu0 %v1746_v36  ;;  %1772 = vmatprep.subr.bf16.mxu1 %v2039_v0 }
  0x53   :  { %1749 = vmatpush3.bf16.msra.mxu0 %v1746_v36  ;;  %1774 = vmatpush3.bf16.msra.mxu1 %v2153_v21 }
  0x54   :  { %1751 = vmatprep.subr.bf16.mxu0 %v1750_v39  ;;  %1775 = vmatprep.subr.bf16.mxu1 %v2039_v0 }
  0x57   :  { %1753 = vmatpush3.bf16.msra.mxu0 %v1750_v39  ;;  %1777 = vmatpush3.bf16.msra.mxu1 %v2164_v29  ;;  %v78_v39 = vld [vmem:[%s2490_s0 + $0x38] sm:$0xff] }
  0x58   :  { %1778 = vmatprep.subr.bf16.mxu0 %v2039_v0  ;;  %1790 = vmatprep.subr.bf16.mxu1 %v2039_v0 }
  0x5a   :  { %1540 = vmatmul.mubr.f32.vlgmr.msra.gmra.mrb[0].mxu0 %v72_v40  ;;  %v2263_v40 = vld [vmem:[%s2495_s5 + $0x8] sm:$0xff] }
  0x5b   :  { %1780 = vmatpush3.bf16.msra.mxu0 %v2146_v9  ;;  %1542 = vmatprep.mubr.f32.mxu0 %v73_v30 }
  0x5c   :  { %1781 = vmatprep.subr.bf16.mxu0 %v2039_v0 }
  0x5e   :  { %1543 = vmatmul.mubr.f32.gmra.mrb[2].mxu0 %v74_v31 }
  0x5f   :  { %1783 = vmatpush3.bf16.msra.mxu0 %v2149_v15  ;;  %1545 = vmatprep.mubr.f32.mxu0 %v75_v32 }
  0x60   :  { %1784 = vmatprep.subr.bf16.mxu0 %v2039_v0 }
  0x62   :  { %1546 = vmatmul.mubr.f32.gmra.mrb[4].mxu0 %v76_v33 }
  0x63   :  { %1786 = vmatpush3.bf16.msra.mxu0 %v2153_v21  ;;  %1548 = vmatprep.mubr.f32.mxu0 %v77_v35 }
  0x64   :  { %1787 = vmatprep.subr.bf16.mxu0 %v2039_v0 }
  0x66   :  { %1549 = vmatmul.mubr.f32.gmra.mrb[6].mxu0 %v78_v39 }
  0x67   :  { %1789 = vmatpush3.bf16.msra.mxu0 %v2164_v29  ;;  %1605 = vmatprep.mubr.msk.f32.mxu0 %vm2040_vm0, %v2041_v1 }
  0x68   :  { %1802 = vmatprep.subr.bf16.mxu0 %v2039_v0 }
  0xaf   :  { %v2192_v41 = vpop.permute.xlu0 %300 }
 0x11d   :  { %v288_v42 = vpop.f32.mrb[0].mxu1 }
 0x11e   :  { %v303_v43 = vadd.f32 %v2192_v41, %v288_v42  ;;  %v1569_v44 = vpop.f32.mrb[1].mxu1 }
 0x120   :  { %305 = vrot.lane.b32.xlu0 %v303_v43, %s2042_s22 }
 0x12d   :  { %v1541_v45 = vpop.f32.mrb[0].mxu0 }
 0x12e   :  { %v161_v46 = vpop.f32.mrb[1].mxu0 }
 0x12f   :  { %v292_v47 = vadd.f32 %v288_v42, %v161_v46 }
 0x131   :  { %v1385_v48 = vmul.f32 -1.442695, %v292_v47 }
 0x133   :  { %1874 = vpow2.f32 %v1385_v48 }
 0x13d   :  { %v1875_v49 = vpop.eup %1874 }
 0x13e   :  { %v296_v50 = vadd.f32 1.0, %v1875_v49 }
 0x140   :  { %1876 = vrcp.f32 %v296_v50 }
 0x14a   :  { %v1877_v51 = vpop.eup %1876 }
 0x192   :  { %v306_v52 = vpop.permute.xlu0 %305 }
 0x193   :  { %v308_v53 = vmul.f32 %v1877_v51, %v306_v52 }
 0x195   :  { %310 = vrot.lane.b32.xlu1 %v308_v53, %s2042_s22 }
 0x207   :  { %v311_v54 = vpop.permute.xlu1 %310 }
 0x208   :  { %v313_v55 = vadd.f32 %v311_v54, %v161_v46 }
 0x20a   :  { %1878 = vtanh.f32 %v313_v55 }
 0x214   :  { %v1879_v56 = vpop.eup %1878 }
 0x215   :  { %v315_v57 = vsub.f32 0.0, %v1879_v56 }
 0x217   :  { %317 = vrot.lane.b32.xlu1 %v315_v57, %s2043_s24 }
 0x289   :  { %v318_v58 = vpop.permute.xlu1 %317 }
 0x28a   :  { %v320_v59 = vmul.f32 %v1877_v51, %v318_v58 }
 0x28c   :  { %322 = vrot.lane.b32.xlu0 %v320_v59, %s2044_s25 }
 0x2fe   :  { %v323_v60 = vpop.permute.xlu0 %322 }
 0x2ff   :  { %v2199_v61 = vadd.f32 %v1879_v56, %v323_v60 }
 0x301   :  { %327 = vrot.lane.b32.xlu1 %v2199_v61, %s2042_s22 }
 0x373   :  { %v328_v63 = vpop.permute.xlu1 %327 }
 0x374   :  { %v330_v2 = vmul.f32 %v328_v63, %v2206_v62 }
 0x376   :  { %339 = vrot.lane.b32.xlu0 %v330_v2, %s2044_s25 }
 0x3e8   :  { %v340_v4 = vpop.permute.xlu0 %339 }
 0x3e9   :  { %v343_v5 = vsel %vm342_vm1, %v330_v2, %v340_v4 }
 0x3ea   :  { %v344_v6 = vmul.f32 %v343_v5, %v2213_v3 }
 0x3ec   :  { %1587 = vmatmul.mubr.msk.f32.vlgmr.msra.gmra.mrb[2].mxu1 %vm218_vm2, %v344_v6 }
 0x3ed   :  { %1792 = vmatpush3.bf16.msra.mxu1 %v2146_v9  ;;  %1624 = vmatprep.mubr.msk.f32.mxu1 %vm2040_vm0, %v2041_v1 }
 0x3ee   :  { %1793 = vmatprep.subr.bf16.mxu1 %v2039_v0 }
 0x3f1   :  { %1795 = vmatpush3.bf16.msra.mxu1 %v2149_v15 }
 0x3f2   :  { %1796 = vmatprep.subr.bf16.mxu1 %v2039_v0 }
 0x3f5   :  { %1798 = vmatpush3.bf16.msra.mxu1 %v2153_v21 }
 0x3f6   :  { %1799 = vmatprep.subr.bf16.mxu1 %v2039_v0 }
 0x3f9   :  { %1801 = vmatpush3.bf16.msra.mxu1 %v2164_v29 }
 0x3fa   :  { %1814 = vmatprep.subr.bf16.mxu1 %v2039_v0 }
 0x4bf   :  { %v414_v7 = vpop.f32.mrb[2].mxu1 }
 0x4c0   :  { %v418_v8 = vadd.f32 %v1541_v45, %v414_v7  ;;  %v425_v10 = vadd.f32 %v414_v7, %v2192_v41  ;;  %v1588_v11 = vpop.f32.mrb[3].mxu1 }
 0x4c2   :  { %427 = vrot.lane.b32.xlu1 %v425_v10, %s2042_s22  ;;  %v1387_v12 = vmul.f32 -1.442695, %v418_v8 }
 0x4c4   :  { %1880 = vpow2.f32 %v1387_v12 }
 0x4c6   :  { %437 = vrot.lane.b32.xlu1 %v344_v6, %s2043_s24 }
 0x4ce   :  { %v1881_v13 = vpop.eup %1880 }
 0x4cf   :  { %v422_v14 = vadd.f32 1.0, %v1881_v13 }
 0x4d1   :  { %1882 = vrcp.f32 %v422_v14 }
 0x4db   :  { %v1883_v16 = vpop.eup %1882 }
 0x534   :  { %v428_v17 = vpop.permute.xlu1 %427 }
 0x535   :  { %v430_v18 = vmul.f32 %v1883_v16, %v428_v17 }
 0x537   :  { %432 = vrot.lane.b32.xlu0 %v430_v18, %s2042_s22 }
 0x538   :  { %v438_v23 = vpop.permute.xlu1 %437 }
 0x539   :  { %v440_v24 = vadd.f32 %v438_v23, %v344_v6 }
 0x5a9   :  { %v433_v19 = vpop.permute.xlu0 %432 }
 0x5aa   :  { %v435_v20 = vadd.f32 %v1541_v45, %v433_v19  ;;  %v2267_v45 = vpop.f32.mrb[2].mxu0 }
 0x5ab   :  { %v171_v46 = vpop.f32.mrb[3].mxu0 }
 0x5ac   :  { %1884 = vtanh.f32 %v435_v20  ;;  %v2269_v47 = vpop.f32.mrb[4].mxu0  ;;  %v2305_v20 = vld [vmem:[%s2495_s5 + $0x10] sm:$0xff] }
 0x5ad   :  { %v2271_v48 = vpop.f32.mrb[5].mxu0 }
 0x5ae   :  { %v2273_v49 = vpop.f32.mrb[6].mxu0 }
 0x5af   :  { %v2275_v50 = vpop.f32.mrb[7].mxu0 }
 0x5b6   :  { %v1885_v22 = vpop.eup %1884 }
 0x5b7   :  { %442 = vrot.lane.b32.xlu0 %v1885_v22, %s2042_s22 }
 0x629   :  { %v443_v25 = vpop.permute.xlu0 %442 }
 0x62a   :  { %v445_v26 = vsub.f32 %v440_v24, %v443_v25 }
 0x62c   :  { %447 = vrot.lane.b32.xlu1 %v445_v26, %s2044_s25 }
 0x630   :  { %457 = vrot.lane.b32.xlu1 %v440_v24, %s2042_s22 }
 0x69e   :  { %v448_v27 = vpop.permute.xlu1 %447 }
 0x69f   :  { %v450_v28 = vmul.f32 %v1883_v16, %v448_v27 }
 0x6a1   :  { %452 = vrot.lane.b32.xlu0 %v450_v28, %s2044_s25 }
 0x6a2   :  { %v458_v37 = vpop.permute.xlu1 %457 }
 0x713   :  { %v453_v34 = vpop.permute.xlu0 %452 }
 0x714   :  { %v2251_v36 = vadd.f32 %v1885_v22, %v453_v34 }
 0x716   :  { %v460_v38 = vsub.f32 %v2251_v36, %v458_v37 }
 0x718   :  { %462 = vrot.lane.b32.xlu0 %v460_v38, %s2042_s22 }
 0x78a   :  { %v463_v42 = vpop.permute.xlu0 %462 }
 0x78b   :  { %v465_v43 = vmul.f32 %v463_v42, %v2263_v40 }
 0x78d   :  { %v466_v44 = vadd.f32 %v465_v43, %v440_v24 }
 0x78f   :  { %475 = vrot.lane.b32.xlu1 %v466_v44, %s2044_s25 }
 0x801   :  { %v476_v51 = vpop.permute.xlu1 %475 }
 0x802   :  { %v478_v52 = vsel %vm342_vm1, %v466_v44, %v476_v51 }
 0x803   :  { %v479_v53 = vmul.f32 %v478_v52, %v2213_v3 }
 0x805   :  { %1606 = vmatmul.mubr.msk.f32.vlgmr.msra.gmra.mrb[8].mxu0 %vm218_vm2, %v479_v53 }
 0x806   :  { %1804 = vmatpush3.bf16.msra.mxu0 %v2146_v9  ;;  %1643 = vmatprep.mubr.msk.f32.mxu0 %vm2040_vm0, %v2041_v1 }
 0x807   :  { %1805 = vmatprep.subr.bf16.mxu0 %v2039_v0 }
 0x80a   :  { %1807 = vmatpush3.bf16.msra.mxu0 %v2149_v15 }
 0x80b   :  { %1808 = vmatprep.subr.bf16.mxu0 %v2039_v0 }
 0x80e   :  { %1810 = vmatpush3.bf16.msra.mxu0 %v2153_v21 }
 0x80f   :  { %1811 = vmatprep.subr.bf16.mxu0 %v2039_v0 }
 0x812   :  { %1813 = vmatpush3.bf16.msra.mxu0 %v2164_v29 }
 0x813   :  { %1826 = vmatprep.subr.bf16.mxu0 %v2039_v0 }
 0x8d8   :  { %v549_v54 = vpop.f32.mrb[8].mxu0 }
 0x8d9   :  { %v553_v55 = vadd.f32 %v549_v54, %v171_v46  ;;  %v560_v56 = vadd.f32 %v549_v54, %v2192_v41  ;;  %v1607_v57 = vpop.f32.mrb[9].mxu0 }
 0x8db   :  { %562 = vrot.lane.b32.xlu0 %v560_v56, %s2042_s22  ;;  %v1389_v58 = vmul.f32 -1.442695, %v553_v55 }
 0x8dd   :  { %1886 = vpow2.f32 %v1389_v58 }
 0x8df   :  { %572 = vrot.lane.b32.xlu0 %v479_v53, %s2043_s24 }
 0x8e7   :  { %v1887_v59 = vpop.eup %1886 }
 0x8e8   :  { %v557_v60 = vadd.f32 1.0, %v1887_v59  ;;  %v2339_v59 = vld [vmem:[%s2495_s5 + $0x18] sm:$0xff] }
 0x8ea   :  { %1888 = vrcp.f32 %v557_v60 }
 0x8f4   :  { %v1889_v63 = vpop.eup %1888 }
 0x94d   :  { %v563_v2 = vpop.permute.xlu0 %562 }
 0x94e   :  { %v565_v4 = vmul.f32 %v1889_v63, %v563_v2 }
 0x950   :  { %567 = vrot.lane.b32.xlu1 %v565_v4, %s2042_s22 }
 0x951   :  { %v573_v8 = vpop.permute.xlu0 %572 }
 0x952   :  { %v575_v10 = vadd.f32 %v573_v8, %v479_v53 }
 0x9c2   :  { %v568_v5 = vpop.permute.xlu1 %567 }
 0x9c3   :  { %v570_v6 = vadd.f32 %v568_v5, %v171_v46 }
 0x9c5   :  { %1890 = vtanh.f32 %v570_v6 }
 0x9cf   :  { %v1891_v7 = vpop.eup %1890 }
 0x9d0   :  { %577 = vrot.lane.b32.xlu1 %v1891_v7, %s2042_s22 }
 0xa42   :  { %v578_v11 = vpop.permute.xlu1 %577 }
 0xa43   :  { %v580_v12 = vsub.f32 %v575_v10, %v578_v11 }
 0xa45   :  { %582 = vrot.lane.b32.xlu0 %v580_v12, %s2044_s25 }
 0xa49   :  { %592 = vrot.lane.b32.xlu0 %v575_v10, %s2042_s22 }
 0xab7   :  { %v583_v13 = vpop.permute.xlu0 %582 }
 0xab8   :  { %v585_v14 = vmul.f32 %v1889_v63, %v583_v13 }
 0xaba   :  { %587 = vrot.lane.b32.xlu1 %v585_v14, %s2044_s25 }
 0xabb   :  { %v593_v18 = vpop.permute.xlu0 %592 }
 0xb2c   :  { %v588_v16 = vpop.permute.xlu1 %587 }
 0xb2d   :  { %v2298_v17 = vadd.f32 %v1891_v7, %v588_v16 }
 0xb2f   :  { %v595_v19 = vsub.f32 %v2298_v17, %v593_v18 }
 0xb31   :  { %597 = vrot.lane.b32.xlu1 %v595_v19, %s2042_s22 }
 0xba3   :  { %v598_v22 = vpop.permute.xlu1 %597 }
 0xba4   :  { %v600_v23 = vmul.f32 %v598_v22, %v2305_v20 }
 0xba6   :  { %v601_v24 = vadd.f32 %v600_v23, %v575_v10 }
 0xba8   :  { %610 = vrot.lane.b32.xlu0 %v601_v24, %s2044_s25 }
 0xc1a   :  { %v611_v25 = vpop.permute.xlu0 %610 }
 0xc1b   :  { %v613_v26 = vsel %vm342_vm1, %v601_v24, %v611_v25 }
 0xc1c   :  { %v614_v27 = vmul.f32 %v613_v26, %v2213_v3 }
 0xc1e   :  { %1625 = vmatmul.mubr.msk.f32.vlgmr.msra.gmra.mrb[4].mxu1 %vm218_vm2, %v614_v27 }
 0xc1f   :  { %1816 = vmatpush3.bf16.msra.mxu1 %v2146_v9  ;;  %1662 = vmatprep.mubr.msk.f32.mxu1 %vm2040_vm0, %v2041_v1 }
 0xc20   :  { %1817 = vmatprep.subr.bf16.mxu1 %v2039_v0 }
 0xc23   :  { %1819 = vmatpush3.bf16.msra.mxu1 %v2149_v15 }
 0xc24   :  { %1820 = vmatprep.subr.bf16.mxu1 %v2039_v0 }
 0xc27   :  { %1822 = vmatpush3.bf16.msra.mxu1 %v2153_v21 }
 0xc28   :  { %1823 = vmatprep.subr.bf16.mxu1 %v2039_v0 }
 0xc2b   :  { %1825 = vmatpush3.bf16.msra.mxu1 %v2164_v29 }
 0xc2c   :  { %1838 = vmatprep.subr.bf16.mxu1 %v2039_v0 }
 0xcf1   :  { %v684_v28 = vpop.f32.mrb[4].mxu1 }
 0xcf2   :  { %v688_v30 = vadd.f32 %v2267_v45, %v684_v28  ;;  %v695_v31 = vadd.f32 %v684_v28, %v2192_v41  ;;  %v1626_v32 = vpop.f32.mrb[5].mxu1 }
 0xcf4   :  { %697 = vrot.lane.b32.xlu1 %v695_v31, %s2042_s22  ;;  %v1391_v33 = vmul.f32 -1.442695, %v688_v30 }
 0xcf6   :  { %1892 = vpow2.f32 %v1391_v33 }
 0xcf8   :  { %707 = vrot.lane.b32.xlu1 %v614_v27, %s2043_s24 }
 0xd00   :  { %v1893_v34 = vpop.eup %1892 }
 0xd01   :  { %v692_v35 = vadd.f32 1.0, %v1893_v34 }
 0xd03   :  { %1894 = vrcp.f32 %v692_v35  ;;  %v2373_v35 = vld [vmem:[%s2495_s5 + $0x20] sm:$0xff] }
 0xd0d   :  { %v1895_v37 = vpop.eup %1894 }
 0xd66   :  { %v698_v38 = vpop.permute.xlu1 %697 }
 0xd67   :  { %v700_v39 = vmul.f32 %v1895_v37, %v698_v38 }
 0xd69   :  { %702 = vrot.lane.b32.xlu0 %v700_v39, %s2042_s22 }
 0xd6a   :  { %v708_v46 = vpop.permute.xlu1 %707 }
 0xd6b   :  { %v710_v51 = vadd.f32 %v708_v46, %v614_v27 }
 0xddb   :  { %v703_v42 = vpop.permute.xlu0 %702 }
 0xddc   :  { %v705_v43 = vadd.f32 %v2267_v45, %v703_v42 }
 0xdde   :  { %1896 = vtanh.f32 %v705_v43 }
 0xde8   :  { %v1897_v44 = vpop.eup %1896 }
 0xde9   :  { %712 = vrot.lane.b32.xlu0 %v1897_v44, %s2042_s22 }
 0xe5b   :  { %v713_v52 = vpop.permute.xlu0 %712 }
 0xe5c   :  { %v715_v53 = vsub.f32 %v710_v51, %v713_v52 }
 0xe5e   :  { %717 = vrot.lane.b32.xlu1 %v715_v53, %s2044_s25 }
 0xe62   :  { %727 = vrot.lane.b32.xlu1 %v710_v51, %s2042_s22 }
 0xed0   :  { %v718_v54 = vpop.permute.xlu1 %717 }
 0xed1   :  { %v720_v55 = vmul.f32 %v1895_v37, %v718_v54 }
 0xed3   :  { %722 = vrot.lane.b32.xlu0 %v720_v55, %s2044_s25 }
 0xed4   :  { %v728_v45 = vpop.permute.xlu1 %727 }
 0xf45   :  { %v723_v56 = vpop.permute.xlu0 %722 }
 0xf46   :  { %v2332_v57 = vadd.f32 %v1897_v44, %v723_v56 }
 0xf48   :  { %v730_v58 = vsub.f32 %v2332_v57, %v728_v45 }
 0xf4a   :  { %732 = vrot.lane.b32.xlu0 %v730_v58, %s2042_s22 }
 0xfbc   :  { %v733_v60 = vpop.permute.xlu0 %732 }
 0xfbd   :  { %v735_v63 = vmul.f32 %v733_v60, %v2339_v59 }
 0xfbf   :  { %v736_v2 = vadd.f32 %v735_v63, %v710_v51 }
 0xfc1   :  { %745 = vrot.lane.b32.xlu1 %v736_v2, %s2044_s25 }
0x1033   :  { %v746_v4 = vpop.permute.xlu1 %745 }
0x1034   :  { %v748_v5 = vsel %vm342_vm1, %v736_v2, %v746_v4 }
0x1035   :  { %v749_v6 = vmul.f32 %v748_v5, %v2213_v3 }
0x1037   :  { %1644 = vmatmul.mubr.msk.f32.vlgmr.msra.gmra.mrb[10].mxu0 %vm218_vm2, %v749_v6 }
0x1038   :  { %1828 = vmatpush3.bf16.msra.mxu0 %v2146_v9  ;;  %1681 = vmatprep.mubr.msk.f32.mxu0 %vm2040_vm0, %v2041_v1 }
0x1039   :  { %1829 = vmatprep.subr.bf16.mxu0 %v2039_v0 }
0x103c   :  { %1831 = vmatpush3.bf16.msra.mxu0 %v2149_v15 }
0x103d   :  { %1832 = vmatprep.subr.bf16.mxu0 %v2039_v0 }
0x1040   :  { %1834 = vmatpush3.bf16.msra.mxu0 %v2153_v21 }
0x1041   :  { %1835 = vmatprep.subr.bf16.mxu0 %v2039_v0 }
0x1044   :  { %1837 = vmatpush3.bf16.msra.mxu0 %v2164_v29 }
0x1045   :  { %1850 = vmatprep.subr.bf16.mxu0 %v2039_v0 }
0x110a   :  { %v819_v7 = vpop.f32.mrb[10].mxu0 }
0x110b   :  { %v823_v8 = vadd.f32 %v819_v7, %v2271_v48  ;;  %v830_v10 = vadd.f32 %v819_v7, %v2192_v41  ;;  %v1645_v11 = vpop.f32.mrb[11].mxu0 }
0x110c   :  { %v2406_v11 = vld [vmem:[%s2495_s5 + $0x28] sm:$0xff] }
0x110d   :  { %832 = vrot.lane.b32.xlu0 %v830_v10, %s2042_s22  ;;  %v1393_v12 = vmul.f32 -1.442695, %v823_v8 }
0x110f   :  { %1898 = vpow2.f32 %v1393_v12 }
0x1111   :  { %842 = vrot.lane.b32.xlu0 %v749_v6, %s2043_s24 }
0x1119   :  { %v1899_v13 = vpop.eup %1898 }
0x111a   :  { %v827_v14 = vadd.f32 1.0, %v1899_v13 }
0x111c   :  { %1900 = vrcp.f32 %v827_v14 }
0x1126   :  { %v1901_v16 = vpop.eup %1900 }
0x117f   :  { %v833_v18 = vpop.permute.xlu0 %832 }
0x1180   :  { %v835_v19 = vmul.f32 %v1901_v16, %v833_v18 }
0x1182   :  { %837 = vrot.lane.b32.xlu1 %v835_v19, %s2042_s22 }
0x1183   :  { %v843_v25 = vpop.permute.xlu0 %842 }
0x1184   :  { %v845_v26 = vadd.f32 %v843_v25, %v749_v6 }
0x11f4   :  { %v838_v22 = vpop.permute.xlu1 %837 }
0x11f5   :  { %v840_v23 = vadd.f32 %v838_v22, %v2271_v48 }
0x11f7   :  { %1902 = vtanh.f32 %v840_v23 }
0x1201   :  { %v1903_v24 = vpop.eup %1902 }
0x1202   :  { %847 = vrot.lane.b32.xlu1 %v1903_v24, %s2042_s22 }
0x1274   :  { %v848_v27 = vpop.permute.xlu1 %847 }
0x1275   :  { %v850_v28 = vsub.f32 %v845_v26, %v848_v27 }
0x1277   :  { %852 = vrot.lane.b32.xlu0 %v850_v28, %s2044_s25 }
0x127b   :  { %862 = vrot.lane.b32.xlu0 %v845_v26, %s2042_s22 }
0x12e9   :  { %v853_v30 = vpop.permute.xlu0 %852 }
0x12ea   :  { %v855_v31 = vmul.f32 %v1901_v16, %v853_v30 }
0x12ec   :  { %857 = vrot.lane.b32.xlu1 %v855_v31, %s2044_s25 }
0x12ed   :  { %v863_v48 = vpop.permute.xlu0 %862 }
0x135e   :  { %v858_v32 = vpop.permute.xlu1 %857 }
0x135f   :  { %v2366_v33 = vadd.f32 %v1903_v24, %v858_v32 }
0x1361   :  { %v865_v34 = vsub.f32 %v2366_v33, %v863_v48 }
0x1363   :  { %867 = vrot.lane.b32.xlu1 %v865_v34, %s2042_s22 }
0x13d5   :  { %v868_v37 = vpop.permute.xlu1 %867 }
0x13d6   :  { %v870_v38 = vmul.f32 %v868_v37, %v2373_v35 }
0x13d8   :  { %v871_v39 = vadd.f32 %v870_v38, %v845_v26 }
0x13da   :  { %880 = vrot.lane.b32.xlu0 %v871_v39, %s2044_s25 }
0x144c   :  { %v881_v42 = vpop.permute.xlu0 %880 }
0x144d   :  { %v883_v43 = vsel %vm342_vm1, %v871_v39, %v881_v42 }
0x144e   :  { %v884_v44 = vmul.f32 %v883_v43, %v2213_v3 }
0x1450   :  { %1663 = vmatmul.mubr.msk.f32.vlgmr.msra.gmra.mrb[6].mxu1 %vm218_vm2, %v884_v44 }
0x1451   :  { %1840 = vmatpush3.bf16.msra.mxu1 %v2146_v9  ;;  %1700 = vmatprep.mubr.msk.f32.mxu1 %vm2040_vm0, %v2041_v1 }
0x1452   :  { %1841 = vmatprep.subr.bf16.mxu1 %v2039_v0 }
0x1455   :  { %1843 = vmatpush3.bf16.msra.mxu1 %v2149_v15 }
0x1456   :  { %1844 = vmatprep.subr.bf16.mxu1 %v2039_v0 }
0x1459   :  { %1846 = vmatpush3.bf16.msra.mxu1 %v2153_v21 }
0x145a   :  { %1847 = vmatprep.subr.bf16.mxu1 %v2039_v0 }
0x145d   :  { %1849 = vmatpush3.bf16.msra.mxu1 %v2164_v29 }
0x1523   :  { %v954_v46 = vpop.f32.mrb[6].mxu1 }
0x1524   :  { %v958_v51 = vadd.f32 %v2269_v47, %v954_v46  ;;  %v965_v9 = vadd.f32 %v954_v46, %v2192_v41  ;;  %v1664_v52 = vpop.f32.mrb[7].mxu1 }
0x1525   :  { %v2429_v52 = vld [vmem:[%s2495_s5 + $0x30] sm:$0xff] }
0x1526   :  { %967 = vrot.lane.b32.xlu1 %v965_v9, %s2042_s22  ;;  %v1395_v53 = vmul.f32 -1.442695, %v958_v51 }
0x1528   :  { %1904 = vpow2.f32 %v1395_v53 }
0x152a   :  { %977 = vrot.lane.b32.xlu1 %v884_v44, %s2043_s24 }
0x1532   :  { %v1905_v15 = vpop.eup %1904 }
0x1533   :  { %v962_v54 = vadd.f32 1.0, %v1905_v15 }
0x1535   :  { %1906 = vrcp.f32 %v962_v54 }
0x153f   :  { %v1907_v21 = vpop.eup %1906 }
0x1598   :  { %v968_v55 = vpop.permute.xlu1 %967 }
0x1599   :  { %v970_v56 = vmul.f32 %v1907_v21, %v968_v55 }
0x159b   :  { %972 = vrot.lane.b32.xlu0 %v970_v56, %s2042_s22 }
0x159c   :  { %v978_v60 = vpop.permute.xlu1 %977 }
0x159d   :  { %v980_v63 = vadd.f32 %v978_v60, %v884_v44 }
0x160d   :  { %v973_v29 = vpop.permute.xlu0 %972 }
0x160e   :  { %v975_v45 = vadd.f32 %v2269_v47, %v973_v29 }
0x1610   :  { %1908 = vtanh.f32 %v975_v45 }
0x161a   :  { %v1909_v58 = vpop.eup %1908 }
0x161b   :  { %982 = vrot.lane.b32.xlu0 %v1909_v58, %s2042_s22 }
0x168d   :  { %v983_v2 = vpop.permute.xlu0 %982 }
0x168e   :  { %v985_v4 = vsub.f32 %v980_v63, %v983_v2 }
0x1690   :  { %987 = vrot.lane.b32.xlu1 %v985_v4, %s2044_s25 }
0x1694   :  { %997 = vrot.lane.b32.xlu1 %v980_v63, %s2042_s22 }
0x1702   :  { %v988_v5 = vpop.permute.xlu1 %987 }
0x1703   :  { %v990_v6 = vmul.f32 %v1907_v21, %v988_v5 }
0x1705   :  { %992 = vrot.lane.b32.xlu0 %v990_v6, %s2044_s25 }
0x1706   :  { %v998_v47 = vpop.permute.xlu1 %997 }
0x1777   :  { %v993_v7 = vpop.permute.xlu0 %992 }
0x1778   :  { %v2399_v8 = vadd.f32 %v1909_v58, %v993_v7 }
0x177a   :  { %v1000_v10 = vsub.f32 %v2399_v8, %v998_v47 }
0x177c   :  { %1002 = vrot.lane.b32.xlu0 %v1000_v10, %s2042_s22 }
0x17ee   :  { %v1003_v12 = vpop.permute.xlu0 %1002 }
0x17ef   :  { %v1005_v13 = vmul.f32 %v1003_v12, %v2406_v11 }
0x17f1   :  { %v1006_v14 = vadd.f32 %v1005_v13, %v980_v63 }
0x17f3   :  { %1015 = vrot.lane.b32.xlu1 %v1006_v14, %s2044_s25 }
0x1865   :  { %v1016_v16 = vpop.permute.xlu1 %1015 }
0x1866   :  { %v1018_v18 = vsel %vm342_vm1, %v1006_v14, %v1016_v16 }
0x1867   :  { %v1019_v19 = vmul.f32 %v1018_v18, %v2213_v3 }
0x1869   :  { %1682 = vmatmul.mubr.msk.f32.vlgmr.msra.gmra.mrb[12].mxu0 %vm218_vm2, %v1019_v19 }
0x186a   :  { %1719 = vmatprep.mubr.msk.f32.mxu0 %vm2040_vm0, %v2041_v1 }
0x193c   :  { %v1089_v22 = vpop.f32.mrb[12].mxu0 }
0x193d   :  { %v1093_v23 = vadd.f32 %v1089_v22, %v2275_v50  ;;  %v1100_v24 = vadd.f32 %v1089_v22, %v2192_v41  ;;  %v1683_v25 = vpop.f32.mrb[13].mxu0 }
0x193f   :  { %1102 = vrot.lane.b32.xlu0 %v1100_v24, %s2042_s22  ;;  %v1397_v26 = vmul.f32 -1.442695, %v1093_v23 }
0x1941   :  { %1910 = vpow2.f32 %v1397_v26  ;;  %v1281_v26 = vld [vmem:[#allocation7 + $0x8] sm:$0xff] }
0x1943   :  { %1112 = vrot.lane.b32.xlu0 %v1019_v19, %s2043_s24 }
0x194b   :  { %v1911_v27 = vpop.eup %1910 }
0x194c   :  { %v1097_v28 = vadd.f32 1.0, %v1911_v27  ;;  %v1282_v27 = vld [vmem:[#allocation7 + $0x10] sm:$0xff] }
0x194e   :  { %1912 = vrcp.f32 %v1097_v28 }
0x1958   :  { %v1913_v30 = vpop.eup %1912 }
0x19b1   :  { %v1103_v31 = vpop.permute.xlu0 %1102 }
0x19b2   :  { %v1105_v32 = vmul.f32 %v1913_v30, %v1103_v31  ;;  %v1284_v31 = vld [vmem:[#allocation7 + $0x20] sm:$0xff] }
0x19b4   :  { %1107 = vrot.lane.b32.xlu1 %v1105_v32, %s2042_s22  ;;  %v1285_v32 = vld [vmem:[#allocation7 + $0x28] sm:$0xff] }
0x19b5   :  { %v1113_v37 = vpop.permute.xlu0 %1112 }
0x19b6   :  { %v1115_v38 = vadd.f32 %v1113_v37, %v1019_v19 }
0x1a26   :  { %v1108_v1 = vpop.permute.xlu1 %1107 }
0x1a27   :  { %v1110_v48 = vadd.f32 %v1108_v1, %v2275_v50  ;;  %v1857_v1 = vpack.c.bf16 %v1285_v32, %v1284_v31 }
0x1a29   :  { %1914 = vtanh.f32 %v1110_v48  ;;  %v1286_v48 = vld [vmem:[#allocation7 + $0x30] sm:$0xff] }
0x1a33   :  { %v1915_v34 = vpop.eup %1914 }
0x1a34   :  { %1117 = vrot.lane.b32.xlu1 %v1915_v34, %s2042_s22 }
0x1aa6   :  { %v1118_v39 = vpop.permute.xlu1 %1117 }
0x1aa7   :  { %v1120_v42 = vsub.f32 %v1115_v38, %v1118_v39 }
0x1aa9   :  { %1122 = vrot.lane.b32.xlu0 %v1120_v42, %s2044_s25 }
0x1aad   :  { %1132 = vrot.lane.b32.xlu0 %v1115_v38, %s2042_s22 }
0x1b1b   :  { %v1123_v43 = vpop.permute.xlu0 %1122 }
0x1b1c   :  { %v1125_v44 = vmul.f32 %v1913_v30, %v1123_v43 }
0x1b1e   :  { %1127 = vrot.lane.b32.xlu1 %v1125_v44, %s2044_s25 }
0x1b1f   :  { %v1133_v9 = vpop.permute.xlu0 %1132 }
0x1b90   :  { %v1128_v46 = vpop.permute.xlu1 %1127 }
0x1b91   :  { %v1130_v51 = vadd.f32 %v1915_v34, %v1128_v46  ;;  %v1287_v34 = vld [vmem:[#allocation7 + $0x38] sm:$0xff] }
0x1b92   :  { %v1860_v37 = vpack.c.bf16 %v1287_v34, %v1286_v48 }
0x1b93   :  { %v1135_v50 = vsub.f32 %v1130_v51, %v1133_v9 }
0x1b95   :  { %1137 = vrot.lane.b32.xlu1 %v1135_v50, %s2042_s22 }
0x1c07   :  { %v1138_v53 = vpop.permute.xlu1 %1137 }
0x1c08   :  { %v1140_v15 = vmul.f32 %v1138_v53, %v2429_v52 }
0x1c0a   :  { %v1141_v54 = vadd.f32 %v1140_v15, %v1115_v38 }
0x1c0c   :  { %1150 = vrot.lane.b32.xlu0 %v1141_v54, %s2044_s25 }
0x1c7e   :  { %v1151_v21 = vpop.permute.xlu0 %1150 }
0x1c7f   :  { %v1153_v55 = vsel %vm342_vm1, %v1141_v54, %v1151_v21 }
0x1c80   :  { %v1154_v56 = vmul.f32 %v1153_v55, %v2213_v3 }
0x1c82   :  { %1701 = vmatmul.mubr.msk.f32.vlgmr.msra.gmra.mrb[8].mxu1 %vm218_vm2, %v1154_v56 }
0x1d55   :  { %v1224_v29 = vpop.f32.mrb[8].mxu1 }
0x1d56   :  { %v1228_v45 = vadd.f32 %v2273_v49, %v1224_v29  ;;  %v1235_v58 = vadd.f32 %v1224_v29, %v2192_v41  ;;  %v1702_v60 = vpop.f32.mrb[9].mxu1 }
0x1d58   :  { %1237 = vrot.lane.b32.xlu1 %v1235_v58, %s2042_s22  ;;  %v1399_v63 = vmul.f32 -1.442695, %v1228_v45 }
0x1d5a   :  { %1916 = vpow2.f32 %v1399_v63 }
0x1d5c   :  { %1247 = vrot.lane.b32.xlu1 %v1154_v56, %s2043_s24 }
0x1d64   :  { %v1917_v2 = vpop.eup %1916 }
0x1d65   :  { %v1232_v4 = vadd.f32 1.0, %v1917_v2 }
0x1d67   :  { %1918 = vrcp.f32 %v1232_v4  ;;  %v1400_v4 = vld [vmem:[%s2497_s7] ss:$0 sm:$0xff] }
0x1d71   :  { %v1919_v5 = vpop.eup %1918 }
0x1dca   :  { %v1238_v6 = vpop.permute.xlu1 %1237 }
0x1dcb   :  { %v1240_v3 = vmul.f32 %v1919_v5, %v1238_v6 }
0x1dcd   :  { %1242 = vrot.lane.b32.xlu0 %v1240_v3, %s2042_s22 }
0x1dce   :  { %v1248_v10 = vpop.permute.xlu1 %1247 }
0x1dcf   :  { %v1250_v12 = vadd.f32 %v1248_v10, %v1154_v56 }
0x1e3f   :  { %v1243_v7 = vpop.permute.xlu0 %1242 }
0x1e40   :  { %v1245_v47 = vadd.f32 %v2273_v49, %v1243_v7 }
0x1e42   :  { %1920 = vtanh.f32 %v1245_v47 }
0x1e43   :  { %1922 = vtanh.f32 %v2199_v61 }
0x1e44   :  { %1924 = vtanh.f32 %v2298_v17 }
0x1e45   :  { %1926 = vtanh.f32 %v2366_v33 }
0x1e46   :  { %1928 = vtanh.f32 %v1130_v51 }
0x1e47   :  { %1930 = vtanh.f32 %v2251_v36 }
0x1e48   :  { %1932 = vtanh.f32 %v2332_v57  ;;  %v1280_v57 = vld [vmem:[#allocation7] sm:$0xff] }
0x1e49   :  { %1934 = vtanh.f32 %v2399_v8  ;;  %v1851_v28 = vpack.c.bf16 %v1281_v26, %v1280_v57  ;;  %v1283_v8 = vld [vmem:[#allocation7 + $0x18] sm:$0xff] }
0x1e4a   :  { %v1854_v30 = vpack.c.bf16 %v1283_v8, %v1282_v27 }
0x1e4b   :  { %1852 = vmatpush3.bf16.msra.mxu0 %v1851_v28 }
0x1e4c   :  { %v1921_v41 = vpop.eup %1920  ;;  %1853 = vmatprep.subr.bf16.mxu0 %v2039_v0 }
0x1e4d   :  { %1252 = vrot.lane.b32.xlu0 %v1921_v41, %s2042_s22  ;;  %v1923_v16 = vpop.eup %1922 }
0x1e4e   :  { %v1925_v49 = vpop.eup %1924 }
0x1e4f   :  { %v1927_v18 = vpop.eup %1926  ;;  %1855 = vmatpush3.bf16.msra.mxu0 %v1854_v30 }
0x1e50   :  { %v1929_v61 = vpop.eup %1928  ;;  %1856 = vmatprep.subr.bf16.mxu0 %v2039_v0 }
0x1e51   :  { %v1931_v33 = vpop.eup %1930 }
0x1e52   :  { %v1933_v22 = vpop.eup %1932 }
0x1e53   :  { %v1935_v23 = vpop.eup %1934  ;;  %1858 = vmatpush3.bf16.msra.mxu0 %v1857_v1 }
0x1e54   :  { %1859 = vmatprep.subr.bf16.mxu0 %v2039_v0 }
0x1e57   :  { %1861 = vmatpush3.bf16.msra.mxu0 %v1860_v37 }
0x1ebf   :  { %v1253_v13 = vpop.permute.xlu0 %1252 }
0x1ec0   :  { %v1255_v14 = vsub.f32 %v1250_v12, %v1253_v13 }
0x1ec2   :  { %1257 = vrot.lane.b32.xlu1 %v1255_v14, %s2044_s25 }
0x1ec6   :  { %334 = vrot.lane.b32.xlu1 %v1923_v16, %s2042_s22 }
0x1eca   :  { %604 = vrot.lane.b32.xlu1 %v1925_v49, %s2042_s22 }
0x1ece   :  { %874 = vrot.lane.b32.xlu1 %v1927_v18, %s2042_s22 }
0x1ed2   :  { %1144 = vrot.lane.b32.xlu1 %v1929_v61, %s2042_s22 }
0x1f34   :  { %v1258_v17 = vpop.permute.xlu1 %1257 }
0x1f35   :  { %v1260_v19 = vmul.f32 %v1919_v5, %v1258_v17 }
0x1f37   :  { %1262 = vrot.lane.b32.xlu0 %v1260_v19, %s2044_s25 }
0x1f38   :  { %v335_v38 = vpop.permute.xlu1 %334 }
0x1f39   :  { %v337_v43 = vmul.f32 %v335_v38, %v2206_v62  ;;  %v217_v62 = vld [vmem:[%s2495_s5 + $0x38] sm:$0xff]  ;;  %s2045_s5 = smov [#allocation8]  }
0x1f3a   :  { %s1375_s28 = sshll.u32 %s2045_s5, 4  ;;  %s1376_s28 = int_to_ptr.vmem [resolvable:$true] %s1375_s28 }
0x1f3b   :  { %469 = vrot.lane.b32.xlu0 %v1931_v33, %s2042_s22  ;;  %s2006_s9 = scalar_lea.vmem %s1376_s28, 64  ;;  %p2011_p11 = scmp.lt.s32.totalorder %s1376_s28, %s1376_s28 }
0x1f3c   :  { %v605_v44 = vpop.permute.xlu1 %604  ;;  %p2007_p10 = scmp.ne.s32.totalorder %s1376_s28, %s2006_s9  ;;  %p2012_p12 = scmp.lt.s32.totalorder %s2006_s9, %s2006_s9 }
0x1f3d   :  { %v607_v9 = vmul.f32 %v605_v44, %v2305_v20 }
0x1f3e   :  { %p2013_p13 = por %p2012_p12, %p2011_p11 }
0x1f3f   :  { %739 = vrot.lane.b32.xlu0 %v1933_v22, %s2042_s22 }
0x1f40   :  { %v875_v15 = vpop.permute.xlu1 %874  ;;  %p2014_p0 = pnand %p2013_p13, %p2007_p10 }
0x1f41   :  { %v877_v0 = vmul.f32 %v875_v15, %v2373_v35 }
0x1f43   :  { %1009 = vrot.lane.b32.xlu0 %v1935_v23, %s2042_s22 }
0x1f44   :  { %v1145_v29 = vpop.permute.xlu1 %1144 }
0x1f45   :  { %v1147_v45 = vmul.f32 %v1145_v29, %v2429_v52 }
0x1fa9   :  { %v1263_v24 = vpop.permute.xlu0 %1262 }
0x1faa   :  { %v1265_v25 = vadd.f32 %v1921_v41, %v1263_v24 }
0x1fac   :  { %1936 = vtanh.f32 %v1265_v25 }
0x1fad   :  { %v470_v39 = vpop.permute.xlu0 %469 }
0x1fae   :  { %v472_v42 = vmul.f32 %v470_v39, %v2263_v40 }
0x1fb0   :  { %v473_v46 = vmax.f32 %v337_v43, %v472_v42 }
0x1fb1   :  { %v740_v51 = vpop.permute.xlu0 %739 }
0x1fb2   :  { %v608_v50 = vmax.f32 %v473_v46, %v607_v9  ;;  %v742_v53 = vmul.f32 %v740_v51, %v2339_v59 }
0x1fb4   :  { %v743_v54 = vmax.f32 %v608_v50, %v742_v53 }
0x1fb5   :  { %v1010_v21 = vpop.permute.xlu0 %1009 }
0x1fb6   :  { %v1937_v36 = vpop.eup %1936  ;;  %v878_v55 = vmax.f32 %v743_v54, %v877_v0  ;;  %v1012_v56 = vmul.f32 %v1010_v21, %v2406_v11 }
0x1fb7   :  { %1268 = vrot.lane.b32.xlu0 %v1937_v36, %s2042_s22 }
0x1fb8   :  { %v1013_v40 = vmax.f32 %v878_v55, %v1012_v56 }
0x1fba   :  { %v1148_v58 = vmax.f32 %v1013_v40, %v1147_v45 }
0x2029   :  { %v1269_v20 = vpop.permute.xlu0 %1268 }
0x202a   :  { %v1271_v60 = vmul.f32 %v1269_v20, %v217_v62 }
0x202c   :  { %v1272_v59 = vmax.f32 %v1148_v58, %v1271_v60 }
0x202e   :  { %1938 = vtanh.f32 %v1272_v59 }
0x2038   :  { %v1939_v63 = vpop.eup %1938 }
0x2039   :  { %v1275_v2 = vrot.slane %v1939_v63, 4 }
0x203b   :  { %1276 = vrot.lane.b32.xlu1 %v1275_v2, %s2044_s25 }
0x20ad   :  { %v1277_v35 = vpop.permute.xlu1 %1276 }
0x20ae   :  { %v1279_v11 = vsel %vm342_vm1, %v1939_v63, %v1277_v35 }
0x20af   :  { %1720 = vmatmul.mubr.msk.f32.vlgmr.msra.gmra.mrb[14].mxu0 %vm218_vm2, %v1279_v11 }
0x2182   :  { %v1364_v52 = vpop.f32.mrb[14].mxu0 }
0x2183   :  { %v1365_v5 = vadd.f32 %v1400_v4, %v1364_v52  ;;  %v1721_v6 = vpop.f32.mrb[15].mxu0 }
0x2185   :  { %1368 = vst [vmem:[#allocation8] sm:$0xf] %v1365_v5 }
0x2186   :  { %2017 = shalt.err (!%p2014_p0)
}
0x2187   :  { %s2018_s11 = scalar_lea.hbm %s2498_s8, 64 }
0x2188   :  { %p2019_p1 = scmp.ne.s32.totalorder %s2498_s8, %s2018_s11  ;;  %p2022_p2 = scmp.lt.u32.totalorder %s2018_s11, %s2498_s8 }
0x218a   :  { %p2024_p3 = pnand %p2022_p2, %p2019_p1 }
0x218c   :  { %2027 = shalt.err (!%p2024_p3)
}
0x218d   :  { %1378 = dma.vmem_to_hbm [thread:$0]  %s1376_s28, 64, %s2498_s8, [#allocation4]  }
0x218e   :  { %2032 = dma.done.wait [#allocation4], 64  }
0x218f   :  { %2033 = vsyncadd [#allocation4], 4294967232 }
0x2190   :  { %1382 = vsyncpa [#allocation3], 1 }
0x2191   :  { %1383 = vsyncpa [#allocation6], 1 }
0x2192   :  { %1384 = vsyncpa [#allocation4], 1 }

</bundles_post_ra>
